<compile_context>
chip_gen: v7x
topology: tpu7x:2x2x1
jax: 0.10.0
libtpu: 0.0.40
codegen_flags: <defaults>
</compile_context>

<pallas_src>
import jax
import jax.numpy as jnp
from jax.experimental import pallas as pl
from jax.experimental.pallas import tpu as pltpu


def _linear_kernel(x_ref, w_ref, b_ref, o_ref):
    # x_ref: [tm, K]   activation tile (resident across the N axis)
    # w_ref: [K, tn]   weight N-tile in MXU-native [K, N] layout
    # b_ref: [1, tn]   bias tile
    # o_ref: [tm, tn]  output tile (lane-dense, tn = 3*128)
    acc = jnp.dot(x_ref[...], w_ref[...], preferred_element_type=jnp.float32)
    o_ref[...] = (acc + b_ref[...]).astype(o_ref.dtype)


def pallas_linear(x2d, weight_kn, bias, *, tm=192, tn=384):
    """x2d: [M, K], weight_kn: [K, N] (pre-transposed once), bias: [N] -> [M, N]."""
    M, K = x2d.shape
    K2, N = weight_kn.shape
    assert K == K2
    assert M % tm == 0 and N % tn == 0
    assert tm % 8 == 0 and tn % 128 == 0 and K % 128 == 0
    b2d = bias.reshape(1, N)

    # Grid: N outer (megacore-parallel on v7x), M inner (arbitrary).
    grid = (N // tn, M // tm)  # = (2, 2)

    return pl.pallas_call(
        _linear_kernel,
        out_shape=jax.ShapeDtypeStruct((M, N), x2d.dtype),
        grid_spec=pltpu.PrefetchScalarGridSpec(
            num_scalar_prefetch=0,
            grid=grid,
            in_specs=[
                # activation: varies with i only (constant in j -> VMEM-resident
                # w.r.t. the N axis, streamed over the inner M loop)
                pl.BlockSpec((tm, K), lambda j, i: (i, 0)),
                # weight: streamed over N, constant across the inner M loop
                pl.BlockSpec((K, tn), lambda j, i: (0, j)),
                # bias: N-tile matching the weight tile
                pl.BlockSpec((1, tn), lambda j, i: (0, j)),
            ],
            out_specs=pl.BlockSpec((tm, tn), lambda j, i: (i, j)),
        ),
        compiler_params=pltpu.CompilerParams(
            dimension_semantics=("parallel", "arbitrary"),  # N parallel, M arbitrary
        ),
    )(x2d, weight_kn, b2d)


def prepare_weight(weight_nk):
    """One-time parameter re-layout: PyTorch [out, in] -> MXU-native [in, out]."""
    return jnp.transpose(weight_nk)


def forward(x130, weight_kn, bias):
    """Reproduces M.forward: flatten(2) then Linear(768, 768)."""
    B, S, H, D = x130.shape            # [1, 384, 12, 64]
    K = H * D                          # 768
    x2d = x130.reshape(B * S, K)       # flatten(2) + collapse batch (contiguous)
    out2d = pallas_linear(x2d, weight_kn, bias)
    return out2d.reshape(B, S, weight_kn.shape[1])


if __name__ == "__main__":
    key = jax.random.PRNGKey(0)
    k_x, k_w, k_b = jax.random.split(key, 3)

    B, S, H, D = 1, 384, 12, 64
    in_features = H * D                # 768
    out_features = 768

    # Deterministic inputs / parameters (PyTorch-style uniform init bounds).
    x130 = jax.random.normal(k_x, (B, S, H, D), dtype=jnp.float32)
    bound = 1.0 / jnp.sqrt(in_features)
    weight = jax.random.uniform(
        k_w, (out_features, in_features), minval=-bound, maxval=bound,
        dtype=jnp.float32)
    bias = jax.random.uniform(
        k_b, (out_features,), minval=-bound, maxval=bound, dtype=jnp.float32)

    # One-time parameter prep (would happen at model-load time).
    weight_kn = jax.block_until_ready(prepare_weight(weight))

    out = forward(x130, weight_kn, bias)
    out = jax.block_until_ready(out)

    # Sanity check against plain-JAX reference (PyTorch layout).
    ref = x130.reshape(B, S, in_features) @ weight.T + bias
    assert out.shape == (B, S, out_features)
    assert jnp.allclose(out, ref, atol=1e-4, rtol=1e-4)

    print("KERNEL_OK")
</pallas_src>

<mosaic_0001>
module attributes {stable_mosaic.version = 11 : i64} {
  func.func @_linear_kernel(%arg0: i32, %arg1: i32, %arg2: memref<192x768xf32, #tpu.memory_space<vmem>>, %arg3: memref<768x384xf32, #tpu.memory_space<vmem>>, %arg4: memref<1x384xf32, #tpu.memory_space<vmem>>, %arg5: memref<192x384xf32, #tpu.memory_space<vmem>>) attributes {dimension_semantics = [#tpu.dimension_semantics<parallel>, #tpu.dimension_semantics<arbitrary>], iteration_bounds = array<i64: 2, 2>, scalar_prefetch = 0 : i64, scratch_operands = 0 : i64, tpu.core_type = #tpu.core_type<tc>, window_params = [{transform_indices = @transform_0, window_bounds = array<i64: 192, 768>}, {transform_indices = @transform_1, window_bounds = array<i64: 768, 384>}, {transform_indices = @transform_2, window_bounds = array<i64: 1, 384>}, {transform_indices = @transform_3, window_bounds = array<i64: 192, 384>}]} {
    %c0 = arith.constant 0 : index
    %c0_0 = arith.constant 0 : index
    %0 = vector.load %arg2[%c0, %c0_0] : memref<192x768xf32, #tpu.memory_space<vmem>>, vector<192x768xf32>
    %c0_1 = arith.constant 0 : index
    %c0_2 = arith.constant 0 : index
    %1 = vector.load %arg3[%c0_1, %c0_2] : memref<768x384xf32, #tpu.memory_space<vmem>>, vector<768x384xf32>
    %cst = arith.constant dense<0.000000e+00> : vector<192x384xf32>
    %2 = tpu.matmul %0, %1, %cst {dimension_numbers = #tpu.dot_dimension_numbers<[1], [0], [0], [1], [0, 0, 1, 1], [], []>} : vector<192x768xf32>, vector<768x384xf32>, vector<192x384xf32> -> vector<192x384xf32>
    %c0_3 = arith.constant 0 : index
    %c0_4 = arith.constant 0 : index
    %3 = vector.load %arg4[%c0_3, %c0_4] : memref<1x384xf32, #tpu.memory_space<vmem>>, vector<1x384xf32>
    %4 = vector.broadcast %3 : vector<1x384xf32> to vector<192x384xf32>
    %5 = arith.addf %2, %4 : vector<192x384xf32>
    %c0_5 = arith.constant 0 : index
    %c0_6 = arith.constant 0 : index
    %6 = vector.load %arg5[%c0_5, %c0_6] : memref<192x384xf32, #tpu.memory_space<vmem>>, vector<192x384xf32>
    tpu.vector_store %arg5[%c0_5, %c0_6], %5 {strides = array<i32>} : memref<192x384xf32, #tpu.memory_space<vmem>>, vector<192x384xf32>,
    return
  }
  func.func @transform_0(%arg0: i32, %arg1: i32) -> (i32, i32) {
    %c0_i32 = arith.constant 0 : i32
    %c0_i32_0 = arith.constant 0 : i32
    return %arg1, %c0_i32 : i32, i32
  }
  func.func @transform_1(%arg0: i32, %arg1: i32) -> (i32, i32) {
    %c0_i32 = arith.constant 0 : i32
    %c0_i32_0 = arith.constant 0 : i32
    return %c0_i32, %arg0 : i32, i32
  }
  func.func @transform_2(%arg0: i32, %arg1: i32) -> (i32, i32) {
    %c0_i32 = arith.constant 0 : i32
    %c0_i32_0 = arith.constant 0 : i32
    return %c0_i32, %arg0 : i32, i32
  }
  func.func @transform_3(%arg0: i32, %arg1: i32) -> (i32, i32) {
    %c0_i32 = arith.constant 0 : i32
    return %arg1, %arg0 : i32, i32
  }
}

</mosaic_0001>

<bundles_post_ra>
// kernel: tpu_custom_call.1
= control target key start
LH: loop header
LB: loop body
LE: loop exit
PB: predicated region body
PF: predicated region fallthrough
CT: control target
= control target key end

     0   :  { %s4192_s0 = inlined_call_operand.hbm [shape: f32[384,768], index: 0, kind: input, shape index: {}]   ;;  %s4193_s1 = inlined_call_operand.hbm [shape: f32[768,768], index: 1, kind: input, shape index: {}]   ;;  %s4194_s2 = inlined_call_operand.hbm [shape: f32[1,768], index: 2, kind: input, shape index: {}]   ;;  %s4195_s3 = inlined_call_operand.hbm [shape: f32[384,768], index: 3, kind: output, shape index: {}]  }
   0x1   :  { %4210 = sst [smem:[#allocation21_spill]] %s4192_s0 }
   0x2   :  { %4211 = sst [smem:[#allocation22_spill]] %s4193_s1 }
   0x3   :  { %4212 = sst [smem:[#allocation23_spill]] %s4195_s3 }
   0x4   :  { %8 = vsyncpa [#allocation3], 0 }
   0x5   :  { %10 = vsyncpa [#allocation3 + $0x1], 0 }
   0x6   :  { %11 = vsyncpa [#allocation6], 0 }
   0x7   :  { %13 = vsyncpa [#allocation6 + $0x1], 0 }
   0x8   :  { %14 = vsyncpa [#allocation4], 0 }
   0x9   :  { %16 = vsyncpa [#allocation4 + $0x1], 0  ;;  %s3176_s12 = smov 0   ;;  %s3178_s13 = smov 0  }
   0xa   :  { %s3180_s14 = smov 0   ;;  %s3182_s15 = smov 0  }
   0xb   :  { %s3184_s16 = smov 0   ;;  %s3186_s17 = smov 0  }
   0xc   :  { %s3188_s18 = smov 0   ;;  %s3190_s19 = smov 0  }
   0xd   :  { %s3192_s20 = smov 0   ;;  %s3194_s21 = smov 0  }
   0xe   :  { %s3196_s22 = smov 0   ;;  %s3198_s23 = smov 0  }
   0xf   :  { %s3200_s24 = smov 0   ;;  %s3202_s25 = smov 0  }
  0x10 LB: > { %4213 = sst [smem:[#allocation12_spill]] %s3098_s14  ;;  %p4198_p0 = scmp.eq.s32.totalorder %s3142_s25, 0  ;;  %s3142_s25 = sphi %s3202_s25, %s22_s25   ;;  %s3138_s24 = sphi %s3200_s24, %s4267_s24   ;;  %s3134_s23 = sphi %s3198_s23, %s4255_s23   ;;  %s3130_s22 = sphi %s3196_s22, %s4266_s22   ;;  %s3126_s21 = sphi %s3194_s21, %s4265_s21   ;;  %s3122_s20 = sphi %s3192_s20, %s4264_s20   ;;  %s3118_s19 = sphi %s3190_s19, %s4263_s19   ;;  %s3114_s18 = sphi %s3188_s18, %s4262_s18   ;;  %s3110_s17 = sphi %s3186_s17, %s4261_s17   ;;  %s3106_s16 = sphi %s3184_s16, %s4260_s16   ;;  %s3102_s15 = sphi %s3182_s15, %s4259_s15   ;;  %s3098_s14 = sphi %s3180_s14, %s4250_s14   ;;  %s3094_s13 = sphi %s3178_s13, %s4258_s13   ;;  %s3090_s12 = sphi %s3176_s12, %s4257_s12  }
  0x11   : > { %4214 = sst [smem:[#allocation13_spill]] %s3122_s20  ;;  %p74_p1 = scmp.ne.s32.totalorder %s3110_s17, %s3106_s16 }
  0x12   : > { %4215 = sst [smem:[#allocation14_spill]] %s3126_s21  ;;  %p4197_p3 = scmp.lt.s32.totalorder %s3142_s25, 4 }
  0x13   : > { %4216 = sst [smem:[#allocation15_spill]] %s3134_s23  ;;  %p76_p4 = por %p74_p1, %p4198_p0 }
  0x14   : > { %s180_s27 = sand.u32 1, %s3142_s25   ;;  %s4196_s28 = sand.u32 1, %s3110_s17  }
  0x15   : > { %s2749_s29 = smul.u32 2304, %s4196_s28  ;;  %p3262_p5 = pnand %p4197_p3, %p76_p4 }
  0x16   : > { %s2145_s30 = smul.u32 384, %s3138_s24  ;;  %s4218_s1 = sld [smem:[#allocation22_spill]] }
  0x17   : > { %s184_s8 = scalar_lea.vmem [#allocation5], %s2749_s29  ;;  %p2141_p6 = scmp.ge.s32.totalorder %s3142_s25, 1 }
  0x18   : > { %s191_s9 = sshll.u32 %s184_s8, 4  ;;  %s3274_s10 = scalar_lea.sflag [#allocation6], %s180_s27  ;;  %s3271_s9 = int_to_ptr.vmem [resolvable:$true] %s191_s9 }
  0x19   : > { %p4202_p8 = pneg %p3262_p5 }
  0x1c   : > { %s3269_s7 = scalar_lea.hbm %s4218_s1, %s2145_s30  ;;  %s2907_s6 = scalar_lea.hbm %s4218_s1, 73728 }
  0x1d   : > { %s2902_s11 = scalar_lea.hbm %s3269_s7, 36864  ;;  %p2908_p11 = scmp.lt.u32.totalorder %s3269_s7, %s4218_s1 }
  0x1e   : > { %p2903_p7 = scmp.ne.s32.totalorder %s3269_s7, %s2902_s11  ;;  %p2909_p12 = scmp.lt.u32.totalorder %s2907_s6, %s2902_s11 }
  0x1f   : > { %p2911_p1 = scmp.lt.u32.totalorder %s2902_s11, %s3269_s7 }
  0x20   : > { %p2905_p9 = pnand %p4202_p8, %p2903_p7  ;;  %p2910_p13 = por %p2909_p12, %p2908_p11 }
  0x22   : > { %p2906_p10 = pneg %p2905_p9  ;;  %p2912_p4 = por %p2911_p1, %p2910_p13 }
  0x24   : > { %p2913_p3 = pnand %p2912_p4, %p2906_p10 }
  0x26   : > { %2916 = shalt.err (!%p2913_p3)
}
  0x27   : > { %s2917_s27 = scalar_lea.vmem %s3271_s9, 36864  ;;  %s3144_s8 = smov [#allocation5]  }
  0x28   : > { %p2918_p7 = scmp.ne.s32.totalorder %s3271_s9, %s2917_s27  ;;  %s2922_s30 = sshll.u32 %s3144_s8, 4  ;;  %s2923_s30 = int_to_ptr.vmem [resolvable:$false] %s2922_s30 }
  0x29   : > { %s2924_s28 = scalar_lea.vmem %s2923_s30, 73728  ;;  %p2925_p0 = scmp.lt.s32.totalorder %s3271_s9, %s2923_s30 }
  0x2a   : > { %p2920_p9 = pnand %p2918_p7, %p4202_p8  ;;  %p2926_p11 = scmp.lt.s32.totalorder %s2924_s28, %s2917_s27 }
  0x2c   : > { %p2921_p2 = pneg %p2920_p9  ;;  %p2927_p12 = por %p2926_p11, %p2925_p0 }
  0x2e   : > { %p2928_p13 = pnand %p2927_p12, %p2921_p2 }
  0x30   : > { %2931 = shalt.err (!%p2928_p13)
}
  0x31   : > { %s4199_s11 = smov 768   ;;  %s3146_s5 = smov 384  }
  0x32   : > { %s3147_s6 = smov 24   ;;  %p218_p0 = scmp.lt.s32.totalorder %s3142_s25, 5 }
  0x33   : > { %2770 = dma.hbm_to_vmem [thread:$0]  (!%p3262_p5), %s3269_s7, 36864, %s3271_s9, %s3274_s10, %s4199_s11, %s3146_s5, %s3147_s6  }
  0x34   : > { %p3306_p2 = pnand %p2141_p6, %p218_p0  ;;  %s3311_s27 = sadd.s32 4294967295, %s3142_s25  }
  0x35   : > { %s2135_s8 = sadd.s32 4294967294, %s3142_s25   ;;  %s31_s30 = sadd.s32 1, %s3134_s23 }
  0x36   : > { %s4219_s29 = scalar_select %p3306_p2, 1, 0 }
  0x37   : > { %s34_s28 = sadd.s32 1, %s3138_s24  ;;  %p32_p3 = scmp.ge.s32.totalorder %s31_s30, 2 }
  0x38   : > { %s41_s26 = sadd.s32 1, %s3122_s20  ;;  %p48_p10 = scmp.ne.s32.totalorder %s3122_s20, %s3118_s19 }
  0x39   : > { %p54_p1 = scmp.ne.s32.totalorder %s3118_s19, %s3114_s18  ;;  %s4269_s30 = smov (%p32_p3, %s31_s30), 0 }
  0x3a   : > { %4220 = sst [smem:[#allocation16_spill]] %s4269_s30  ;;  %s4271_s28 = smov (!%p32_p3, %s34_s28), %s3138_s24 }
  0x3b   : > { %s38_s7 = ssub.s32 %s3134_s23, %s4269_s30  ;;  %p4221_p6 = scmp.eq.s32.totalorder %s3142_s25, 0 }
  0x3c   : > { %p36_p7 = scmp.ge.s32.totalorder %s4271_s28, 2  ;;  %p39_p9 = scmp.eq.s32.totalorder %s38_s7, 0 }
  0x3d   : > { %p3328_p4 = por %p4221_p6, %p48_p10  ;;  %p55_p11 = scmp.eq.s32.totalorder %s3311_s27, 0 }
  0x3e   : > { %s121_s18 = sadd.s32 1, %s3098_s14  ;;  %s4273_s28 = smov (%p36_p7, %s4271_s28), 0 }
  0x3f   : > { %4223 = sst [smem:[#allocation17_spill]] %s4273_s28  ;;  %p3339_p12 = por %p55_p11, %p54_p1 }
  0x40   : > { %s3337_s5 = scalar_select %p39_p9, %s3122_s20, %s41_s26  }
  0x41   : > { %s4225_s6 = scalar_select %p3339_p12, 1, 0 }
  0x42   : > { %4224 = sst [smem:[#allocation18_spill]] %s3337_s5  ;;  %s64_s11 = ssub.s32 %s3138_s24, %s4273_s28 }
  0x43   : > { %p65_p13 = scmp.eq.s32.totalorder %s64_s11, 0  ;;  %p4226_p0 = scmp.ne.s32.totalorder %s3106_s16, %s3102_s15 }
  0x44   : > { %s118_s30 = sor.u32 %s64_s11, %s38_s7  ;;  %p131_p10 = scmp.ne.s32.totalorder %s3098_s14, %s3094_s13 }
  0x45   : > { %p3348_p3 = por %p4226_p0, %p55_p11  ;;  %s4228_s3 = sadd.s32 1, %s3110_s17 }
  0x46   : > { %s3357_s21 = scalar_select %p65_p13, %s3110_s17, %s4228_s3  }
  0x47   : > { %s4227_s1 = scalar_select %p3348_p3, 1, 0 }
  0x48   : > { %4229 = sst [smem:[#allocation19_spill]] %s3357_s21  ;;  %p119_p6 = scmp.eq.s32.totalorder %s118_s30, 0 }
  0x49   : > { %p132_p1 = scmp.eq.s32.totalorder %s3311_s27, 3  ;;  %p137_p7 = scmp.ne.s32.totalorder %s3094_s13, %s3090_s12 }
  0x4a   : > { %p138_p9 = scmp.eq.s32.totalorder %s2135_s8, 3  ;;  %s158_s5 = sand.u32 1, %s3122_s20  }
  0x4b   : > { %s3363_s26 = scalar_select %p119_p6, %s3098_s14, %s121_s18  }
  0x4c   : > { %p3365_p8 = por %p132_p1, %p131_p10  ;;  %p3369_p12 = por %p138_p9, %p137_p7 }
  0x4d   : > { %4230 = sst [smem:[#allocation20_spill]] %s3363_s26  ;;  %s2747_s11 = smul.u32 1152, %s158_s5 }
  0x4e   : > { %s4231_s28 = scalar_select %p3365_p8, 1, 0 }
  0x4f   : > { %s4232_s15 = scalar_select %p3369_p12, 1, 0 }
  0x50   : > { %s2779_s7 = smul.u32 18432, %s3134_s23  ;;  %p4233_p11 = scmp.lt.s32.totalorder %s3142_s25, 4 }
  0x51   : > { %s4235_s0 = sld [smem:[#allocation21_spill]]  ;;  %s162_s20 = scalar_lea.vmem [#allocation2], %s2747_s11 }
  0x52   : > { %p3379_p13 = pnand %p4233_p11, %p3328_p4  ;;  %s170_s21 = sshll.u32 %s162_s20, 4  ;;  %s3388_s21 = int_to_ptr.vmem [resolvable:$true] %s170_s21 }
  0x53   : > { %s3390_s9 = scalar_lea.sflag [#allocation3], %s158_s5 }
  0x54   : > { %p2934_p0 = pneg %p3379_p13 }
  0x57   : > { %s3386_s18 = scalar_lea.hbm %s4235_s0, %s2779_s7  ;;  %s2937_s30 = scalar_lea.hbm %s4235_s0, 36864 }
  0x58   : > { %s2932_s23 = scalar_lea.hbm %s3386_s18, 18432  ;;  %p2938_p1 = scmp.lt.u32.totalorder %s3386_s18, %s4235_s0 }
  0x59   : > { %p2933_p4 = scmp.ne.s32.totalorder %s3386_s18, %s2932_s23  ;;  %p2939_p7 = scmp.lt.u32.totalorder %s2937_s30, %s2932_s23 }
  0x5a   : > { %p2941_p11 = scmp.lt.u32.totalorder %s2932_s23, %s3386_s18 }
  0x5b   : > { %p2935_p10 = pnand %p2934_p0, %p2933_p4  ;;  %p2940_p9 = por %p2939_p7, %p2938_p1 }
  0x5d   : > { %p2936_p6 = pneg %p2935_p10  ;;  %p2942_p12 = por %p2941_p11, %p2940_p9 }
  0x5f   : > { %p2943_p8 = pnand %p2942_p12, %p2936_p6 }
  0x61   : > { %2946 = shalt.err (!%p2943_p8)
}
  0x62   : > { %s2947_s20 = scalar_lea.vmem %s3388_s21, 18432  ;;  %s3148_s5 = smov [#allocation2]  }
  0x63   : > { %p2948_p4 = scmp.ne.s32.totalorder %s3388_s21, %s2947_s20  ;;  %s2952_s11 = sshll.u32 %s3148_s5, 4  ;;  %s2953_s11 = int_to_ptr.vmem [resolvable:$false] %s2952_s11 }
  0x64   : > { %s2954_s14 = scalar_lea.vmem %s2953_s11, 36864  ;;  %p2955_p2 = scmp.lt.s32.totalorder %s3388_s21, %s2953_s11 }
  0x65   : > { %p2950_p10 = pnand %p2948_p4, %p2934_p0  ;;  %p2956_p1 = scmp.lt.s32.totalorder %s2954_s14, %s2947_s20 }
  0x67   : > { %p2951_p3 = pneg %p2950_p10  ;;  %p2957_p7 = por %p2956_p1, %p2955_p2 }
  0x69   : > { %p2958_p9 = pnand %p2957_p7, %p2951_p3 }
  0x6b   : > { %2961 = shalt.err (!%p2958_p9)
}
  0x6c   : > { %s3149_s23 = smov 48   ;;  %s4236_s26 = smov 768  }
  0x6d   : > { %2767 = dma.hbm_to_vmem [thread:$0]  (!%p3379_p13), %s3386_s18, 18432, %s3388_s21, %s3390_s9, %s4236_s26, %s4236_s26, %s3149_s23  }
  0x6e   : > { %s4237_s7 = sand.u32 1, %s3110_s17   ;;  %s2146_s30 = smul.u32 48, %s3138_s24 }
  0x6f   : > { %s2750_s8 = smul.u32 3, %s4237_s7  ;;  %p4238_p2 = pneg %p3262_p5 }
  0x70   : > { %s3426_s11 = scalar_lea.hbm %s4194_s2, %s2146_s30  ;;  %s2967_s9 = scalar_lea.hbm %s4194_s2, 96 }
  0x71   : > { %s205_s3 = scalar_lea.vmem [#allocation7], %s2750_s8  ;;  %s2962_s0 = scalar_lea.hbm %s3426_s11, 48 }
  0x72   : > { %s213_s14 = sshll.u32 %s205_s3, 4  ;;  %p2963_p8 = scmp.ne.s32.totalorder %s3426_s11, %s2962_s0  ;;  %s214_s14 = int_to_ptr.vmem [resolvable:$true] %s213_s14 }
  0x73   : > { %p2968_p13 = scmp.lt.u32.totalorder %s3426_s11, %s4194_s2  ;;  %p2969_p0 = scmp.lt.u32.totalorder %s2967_s9, %s2962_s0 }
  0x74   : > { %p2965_p12 = pnand %p2963_p8, %p4238_p2  ;;  %p2971_p11 = scmp.lt.u32.totalorder %s2962_s0, %s3426_s11 }
  0x75   : > { %p2970_p6 = por %p2969_p0, %p2968_p13 }
  0x76   : > { %p2966_p3 = pneg %p2965_p12 }
  0x77   : > { %p2972_p4 = por %p2971_p11, %p2970_p6 }
  0x79   : > { %p2973_p10 = pnand %p2972_p4, %p2966_p3 }
  0x7b   : > { %2976 = shalt.err (!%p2973_p10)
}
  0x7c   : > { %s2977_s7 = scalar_lea.vmem %s214_s14, 48  ;;  %p4239_p7 = pmov %p4238_p2 }
  0x7d   : > { %p2978_p1 = scmp.ne.s32.totalorder %s214_s14, %s2977_s7  ;;  %s3150_s8 = smov [#allocation7]  }
  0x7e   : > { %s2982_s30 = sshll.u32 %s3150_s8, 4  ;;  %s2983_s30 = int_to_ptr.vmem [resolvable:$false] %s2982_s30 }
  0x7f   : > { %p2980_p9 = pnand %p2978_p1, %p4239_p7  ;;  %s2984_s5 = scalar_lea.vmem %s2983_s30, 96 }
  0x80   : > { %p2985_p2 = scmp.lt.s32.totalorder %s214_s14, %s2983_s30  ;;  %p2986_p12 = scmp.lt.s32.totalorder %s2984_s5, %s2977_s7 }
  0x81   : > { %p2981_p8 = pneg %p2980_p9 }
  0x82   : > { %p2987_p0 = por %p2986_p12, %p2985_p2 }
  0x84   : > { %p2988_p13 = pnand %p2987_p0, %p2981_p8 }
  0x86   : > { %2991 = shalt.err (!%p2988_p13)
}
  0x87   : > { %2773 = dma.hbm_to_vmem [thread:$0]  (!%p3262_p5), %s3426_s11, 48, %s214_s14, %s3274_s10  }
  0x88   : > { %p4240_p3 = scmp.ne.s32.totalorder %s4219_s29, 0 }
  0x89   : > { %s224_s0 = sand.u32 (!%p4240_p3), 1, %s3118_s19   ;;  %p4241_p6 = scmp.ne.s32.totalorder (!%p4240_p3), %s4225_s6, 0 }
  0x8a   : > { %222 = sbr.rel (%p4240_p3) target bundleno = 734 (0x2de), region = 32  ;;  %s225_s3 = scalar_lea.sflag (!%p4240_p3), [#allocation3], %s224_s0 }
  0x8b   : > { %s2751_s20 = smul.u32 (!%p4240_p3), 1152, %s224_s0 }
  0x8d   : > { %s3451_s21 = scalar_lea.vmem (!%p4240_p3), [#allocation2], %s2751_s20 }
  0x91   : > { %3077 = dma.done.wait (%p4241_p6), %s225_s3, 18432  }
  0x92   : > { %3079 = vsyncadd (%p4241_p6), %s225_s3, 4294948864  ;;  %s233_s4 = sand.u32 1, %s3311_s27   ;;  %s235_s10 = sand.u32 1, %s3106_s16  }
  0x93   : > { %s2752_s29 = smul.u32 2304, %s235_s10  ;;  %s234_s11 = scalar_lea.sflag [#allocation6], %s233_s4 }
  0x94   : > { %p4242_p5 = scmp.ne.s32.totalorder %s4227_s1, 0 }
  0x95   : > { %s3461_s14 = scalar_lea.vmem [#allocation5], %s2752_s29 }
  0x96   : > { %3081 = dma.done.wait (%p4242_p5), %s234_s11, 36912  }
  0x97   : > { %3083 = vsyncadd (%p4242_p5), %s234_s11, 4294930384  ;;  %v3151_v0 = vmov 0.0|0.0   ;;  %v429_v1 = vld [vmem:[%s3461_s14 + $0x8] sm:$0xff]  ;;  %v432_v2 = vld [vmem:[%s3461_s14 + $0x20] sm:$0xff]  ;;  %s2753_s1 = smul.u32 3, %s235_s10  ;;  %s276_s27 = sand.u32 1, %s3094_s13  }
  0x98   : > { %2339 = vmatprep.subr.bf16.mxu1 %v3151_v0  ;;  %v430_v3 = vld [vmem:[%s3461_s14 + $0x10] sm:$0xff]  ;;  %v2147_v4 = vpack.c.bf16 %v432_v2, %v429_v1  ;;  %v433_v5 = vld [vmem:[%s3461_s14 + $0x28] sm:$0xff]  ;;  %v428_v6 = vld [vmem:[%s3461_s14] sm:$0xff]  ;;  %s2754_s18 = smul.u32 576, %s276_s27  ;;  %s4243_s23 = sld [smem:[#allocation14_spill]] }
  0x99   : > { %v431_v7 = vld [vmem:[%s3461_s14 + $0x18] sm:$0xff]  ;;  %v2340_v8 = vpack.c.bf16 %v433_v5, %v430_v3  ;;  %v438_v11 = vld [vmem:[%s3461_s14 + $0x50] sm:$0xff]  ;;  %v436_v12 = vld [vmem:[%s3461_s14 + $0x40] sm:$0xff]  ;;  %s246_s6 = scalar_lea.vmem [#allocation7], %s2753_s1  ;;  %s1996_s26 = smul.u32 3, %s3130_s22 }
  0x9a   : > { %v2149_v9 = vpack.c.bf16 %v431_v7, %v428_v6  ;;  %v435_v10 = vld [vmem:[%s3461_s14 + $0x38] sm:$0xff]  ;;  %2148 = vmatprep.subr.bf16.mxu0 %v2147_v4  ;;  %v434_v15 = vld [vmem:[%s3461_s14 + $0x30] sm:$0xff]  ;;  %v437_v16 = vld [vmem:[%s3461_s14 + $0x48] sm:$0xff]  ;;  %s3961_s9 = scalar_lea.vmem [#allocation8], %s2754_s18  ;;  %s4244_s20 = sld [smem:[#allocation23_spill]] }
  0x9b   : > { %v2151_v13 = vpack.c.bf16 %v438_v11, %v435_v10  ;;  %v439_v14 = vld [vmem:[%s3461_s14 + $0x58] sm:$0xff]  ;;  %2341 = vmatpush1.bf16.msra.mxu1 %v2340_v8  ;;  %v2153_v18 = vpack.c.bf16 %v437_v16, %v434_v15  ;;  %v441_v19 = vld [vmem:[%s3461_s14 + $0x68] sm:$0xff]  ;;  %v444_v20 = vld [vmem:[%s3461_s14 + $0x80] sm:$0xff]  ;;  %s2004_s30 = sshll.u32 %s3961_s9, 4  ;;  %s4116_s4 = scalar_lea.sflag [#allocation4], %s276_s27  ;;  %s4108_s30 = int_to_ptr.vmem [resolvable:$true] %s2004_s30 }
  0x9c   : > { %2150 = vmatpush1.bf16.msra.mxu0 %v2149_v9  ;;  %v2343_v17 = vpack.c.bf16 %v439_v14, %v436_v12  ;;  %v442_v21 = vld [vmem:[%s3461_s14 + $0x70] sm:$0xff]  ;;  %2342 = vmatprep.subr.bf16.mxu1 %v3151_v0  ;;  %v2155_v22 = vpack.c.bf16 %v444_v20, %v441_v19  ;;  %v445_v23 = vld [vmem:[%s3461_s14 + $0x88] sm:$0xff]  ;;  %v440_v24 = vld [vmem:[%s3461_s14 + $0x60] sm:$0xff]  ;;  %s2992_s10 = scalar_lea.vmem %s4108_s30, 9216  ;;  %p4246_p4 = scmp.ne.s32.totalorder %s4231_s28, 0 }
  0x9d   : > { %2152 = vmatprep.subr.bf16.mxu0 %v2151_v13  ;;  %v443_v25 = vld [vmem:[%s3461_s14 + $0x78] sm:$0xff]  ;;  %v450_v27 = vld [vmem:[%s3461_s14 + $0xb0] sm:$0xff]  ;;  %v2346_v28 = vpack.c.bf16 %v445_v23, %v442_v21  ;;  %v448_v30 = vld [vmem:[%s3461_s14 + $0xa0] sm:$0xff]  ;;  %p2993_p11 = scmp.ne.s32.totalorder %s4108_s30, %s2992_s10  ;;  %s3152_s29 = smov [#allocation8]  }
  0x9e   : > { %v447_v26 = vld [vmem:[%s3461_s14 + $0x98] sm:$0xff]  ;;  %v2157_v29 = vpack.c.bf16 %v443_v25, %v440_v24  ;;  %v446_v33 = vld [vmem:[%s3461_s14 + $0x90] sm:$0xff]  ;;  %v449_v34 = vld [vmem:[%s3461_s14 + $0xa8] sm:$0xff]  ;;  %s2780_s7 = smul.u32 144, %s4243_s23  ;;  %s2996_s11 = sshll.u32 %s3152_s29, 4  ;;  %s2997_s11 = int_to_ptr.vmem [resolvable:$false] %s2996_s11 }
  0x9f   : > { %2344 = vmatpush1.bf16.msra.mxu1 %v2343_v17  ;;  %v2159_v31 = vpack.c.bf16 %v450_v27, %v447_v26  ;;  %v451_v32 = vld [vmem:[%s3461_s14 + $0xb8] sm:$0xff]  ;;  %v453_v35 = vld [vmem:[%s3461_s14 + $0xc8] sm:$0xff]  ;;  %v456_v36 = vld [vmem:[%s3461_s14 + $0xe0] sm:$0xff]  ;;  %v2161_v38 = vpack.c.bf16 %v449_v34, %v446_v33  ;;  %p2994_p10 = pnand %p2993_p11, %p4246_p4  ;;  %p2999_p7 = scmp.lt.s32.totalorder %s4108_s30, %s2997_s11 }
  0xa0   : > { %2154 = vmatpush1.bf16.msra.mxu0 %v2153_v18  ;;  %2345 = vmatprep.subr.bf16.mxu1 %v3151_v0  ;;  %v2349_v37 = vpack.c.bf16 %v451_v32, %v448_v30  ;;  %v454_v39 = vld [vmem:[%s3461_s14 + $0xd0] sm:$0xff]  ;;  %v2163_v40 = vpack.c.bf16 %v456_v36, %v453_v35  ;;  %v457_v41 = vld [vmem:[%s3461_s14 + $0xe8] sm:$0xff]  ;;  %v452_v42 = vld [vmem:[%s3461_s14 + $0xc0] sm:$0xff]  ;;  %s2001_s22 = sadd.s32 %s2780_s7, %s1996_s26  ;;  %s4245_s3 = smov %s4244_s20 }
  0xa1   : > { %2156 = vmatprep.subr.bf16.mxu0 %v2155_v22  ;;  %v455_v43 = vld [vmem:[%s3461_s14 + $0xd8] sm:$0xff]  ;;  %v462_v45 = vld [vmem:[%s3461_s14 + $0x110] sm:$0xff]  ;;  %v2352_v46 = vpack.c.bf16 %v457_v41, %v454_v39  ;;  %v460_v48 = vld [vmem:[%s3461_s14 + $0x100] sm:$0xff]  ;;  %s2142_s8 = sshll.u32 %s2001_s22, 7  ;;  %p2995_p1 = pneg %p2994_p10 }
  0xa2   : > { %v459_v44 = vld [vmem:[%s3461_s14 + $0xf8] sm:$0xff]  ;;  %v2165_v47 = vpack.c.bf16 %v455_v43, %v452_v42  ;;  %v458_v51 = vld [vmem:[%s3461_s14 + $0xf0] sm:$0xff]  ;;  %v461_v52 = vld [vmem:[%s3461_s14 + $0x108] sm:$0xff] }
  0xa3   : > { %2347 = vmatpush1.bf16.msra.mxu1 %v2346_v28  ;;  %v2167_v49 = vpack.c.bf16 %v462_v45, %v459_v44  ;;  %v463_v50 = vld [vmem:[%s3461_s14 + $0x118] sm:$0xff]  ;;  %v465_v53 = vld [vmem:[%s3461_s14 + $0x128] sm:$0xff]  ;;  %v468_v54 = vld [vmem:[%s3461_s14 + $0x140] sm:$0xff]  ;;  %v2169_v56 = vpack.c.bf16 %v461_v52, %v458_v51 }
  0xa4   : > { %2158 = vmatpush1.bf16.msra.mxu0 %v2157_v29  ;;  %2348 = vmatprep.subr.bf16.mxu1 %v3151_v0  ;;  %v2355_v55 = vpack.c.bf16 %v463_v50, %v460_v48  ;;  %v466_v57 = vld [vmem:[%s3461_s14 + $0x130] sm:$0xff]  ;;  %v2171_v58 = vpack.c.bf16 %v468_v54, %v465_v53  ;;  %v469_v59 = vld [vmem:[%s3461_s14 + $0x148] sm:$0xff]  ;;  %v464_v60 = vld [vmem:[%s3461_s14 + $0x120] sm:$0xff] }
  0xa5   : > { %2160 = vmatprep.subr.bf16.mxu0 %v2159_v31  ;;  %v467_v61 = vld [vmem:[%s3461_s14 + $0x138] sm:$0xff]  ;;  %v474_v63 = vld [vmem:[%s3461_s14 + $0x170] sm:$0xff]  ;;  %v2358_v1 = vpack.c.bf16 %v469_v59, %v466_v57  ;;  %v472_v3 = vld [vmem:[%s3461_s14 + $0x160] sm:$0xff] }
  0xa6   : > { %v471_v62 = vld [vmem:[%s3461_s14 + $0x158] sm:$0xff]  ;;  %v2173_v2 = vpack.c.bf16 %v467_v61, %v464_v60  ;;  %v470_v6 = vld [vmem:[%s3461_s14 + $0x150] sm:$0xff]  ;;  %v473_v7 = vld [vmem:[%s3461_s14 + $0x168] sm:$0xff] }
  0xa7   : > { %2350 = vmatpush1.bf16.msra.mxu1 %v2349_v37  ;;  %v2175_v4 = vpack.c.bf16 %v474_v63, %v471_v62  ;;  %v475_v5 = vld [vmem:[%s3461_s14 + $0x178] sm:$0xff]  ;;  %v477_v8 = vld [vmem:[%s3461_s14 + $0x188] sm:$0xff]  ;;  %v480_v9 = vld [vmem:[%s3461_s14 + $0x1a0] sm:$0xff]  ;;  %v2177_v11 = vpack.c.bf16 %v473_v7, %v470_v6 }
  0xa8   : > { %2162 = vmatpush1.bf16.msra.mxu0 %v2161_v38  ;;  %2351 = vmatprep.subr.bf16.mxu1 %v3151_v0  ;;  %v2361_v10 = vpack.c.bf16 %v475_v5, %v472_v3  ;;  %v478_v12 = vld [vmem:[%s3461_s14 + $0x190] sm:$0xff]  ;;  %v2179_v13 = vpack.c.bf16 %v480_v9, %v477_v8  ;;  %v481_v14 = vld [vmem:[%s3461_s14 + $0x1a8] sm:$0xff]  ;;  %v476_v15 = vld [vmem:[%s3461_s14 + $0x180] sm:$0xff] }
  0xa9   : > { %2164 = vmatprep.subr.bf16.mxu0 %v2163_v40  ;;  %v479_v16 = vld [vmem:[%s3461_s14 + $0x198] sm:$0xff]  ;;  %v486_v18 = vld [vmem:[%s3461_s14 + $0x1d0] sm:$0xff]  ;;  %v2364_v19 = vpack.c.bf16 %v481_v14, %v478_v12  ;;  %v484_v21 = vld [vmem:[%s3461_s14 + $0x1c0] sm:$0xff] }
  0xaa   : > { %v483_v17 = vld [vmem:[%s3461_s14 + $0x1b8] sm:$0xff]  ;;  %v2181_v20 = vpack.c.bf16 %v479_v16, %v476_v15  ;;  %v285_v22 = vld [vmem:[%s3451_s21 + $0x8] sm:$0xff]  ;;  %v482_v25 = vld [vmem:[%s3461_s14 + $0x1b0] sm:$0xff] }
  0xab   : > { %2353 = vmatpush1.bf16.msra.mxu1 %v2352_v46  ;;  %v2183_v23 = vpack.c.bf16 %v486_v18, %v483_v17  ;;  %v487_v24 = vld [vmem:[%s3461_s14 + $0x1d8] sm:$0xff]  ;;  %v485_v26 = vld [vmem:[%s3461_s14 + $0x1c8] sm:$0xff]  ;;  %v492_v28 = vld [vmem:[%s3461_s14 + $0x200] sm:$0xff]  ;;  %1424 = vmatprep.mubr.f32.mxu1 %v285_v22 }
  0xac   : > { %2166 = vmatpush1.bf16.msra.mxu0 %v2165_v47  ;;  %2354 = vmatprep.subr.bf16.mxu1 %v3151_v0  ;;  %v489_v27 = vld [vmem:[%s3461_s14 + $0x1e8] sm:$0xff]  ;;  %v2367_v29 = vpack.c.bf16 %v487_v24, %v484_v21  ;;  %v2185_v30 = vpack.c.bf16 %v485_v26, %v482_v25  ;;  %v490_v31 = vld [vmem:[%s3461_s14 + $0x1f0] sm:$0xff]  ;;  %v488_v34 = vld [vmem:[%s3461_s14 + $0x1e0] sm:$0xff] }
  0xad   : > { %2168 = vmatprep.subr.bf16.mxu0 %v2167_v49  ;;  %797 = vmatprep.mubr.f32.mxu0 %v285_v22  ;;  %v2187_v32 = vpack.c.bf16 %v492_v28, %v489_v27  ;;  %v493_v33 = vld [vmem:[%s3461_s14 + $0x208] sm:$0xff]  ;;  %v491_v35 = vld [vmem:[%s3461_s14 + $0x1f8] sm:$0xff]  ;;  %v498_v37 = vld [vmem:[%s3461_s14 + $0x230] sm:$0xff] }
  0xae   : > { %v495_v36 = vld [vmem:[%s3461_s14 + $0x218] sm:$0xff]  ;;  %v2370_v38 = vpack.c.bf16 %v493_v33, %v490_v31  ;;  %v2189_v39 = vpack.c.bf16 %v491_v35, %v488_v34  ;;  %v496_v40 = vld [vmem:[%s3461_s14 + $0x220] sm:$0xff]  ;;  %v494_v43 = vld [vmem:[%s3461_s14 + $0x210] sm:$0xff] }
  0xaf   : > { %2356 = vmatpush1.bf16.msra.mxu1 %v2355_v55  ;;  %v2191_v41 = vpack.c.bf16 %v498_v37, %v495_v36  ;;  %v499_v42 = vld [vmem:[%s3461_s14 + $0x238] sm:$0xff]  ;;  %v497_v44 = vld [vmem:[%s3461_s14 + $0x228] sm:$0xff]  ;;  %v504_v46 = vld [vmem:[%s3461_s14 + $0x260] sm:$0xff] }
  0xb0   : > { %2170 = vmatpush1.bf16.msra.mxu0 %v2169_v56  ;;  %2357 = vmatprep.subr.bf16.mxu1 %v3151_v0  ;;  %v501_v45 = vld [vmem:[%s3461_s14 + $0x248] sm:$0xff]  ;;  %v2373_v47 = vpack.c.bf16 %v499_v42, %v496_v40  ;;  %v2193_v48 = vpack.c.bf16 %v497_v44, %v494_v43  ;;  %v502_v49 = vld [vmem:[%s3461_s14 + $0x250] sm:$0xff]  ;;  %v500_v52 = vld [vmem:[%s3461_s14 + $0x240] sm:$0xff] }
  0xb1   : > { %2172 = vmatprep.subr.bf16.mxu0 %v2171_v58  ;;  %v2195_v50 = vpack.c.bf16 %v504_v46, %v501_v45  ;;  %v505_v51 = vld [vmem:[%s3461_s14 + $0x268] sm:$0xff]  ;;  %v503_v53 = vld [vmem:[%s3461_s14 + $0x258] sm:$0xff]  ;;  %v510_v55 = vld [vmem:[%s3461_s14 + $0x290] sm:$0xff] }
  0xb2   : > { %v507_v54 = vld [vmem:[%s3461_s14 + $0x278] sm:$0xff]  ;;  %v2376_v56 = vpack.c.bf16 %v505_v51, %v502_v49  ;;  %v2197_v57 = vpack.c.bf16 %v503_v53, %v500_v52  ;;  %v508_v58 = vld [vmem:[%s3461_s14 + $0x280] sm:$0xff]  ;;  %v506_v61 = vld [vmem:[%s3461_s14 + $0x270] sm:$0xff] }
  0xb3   : > { %2359 = vmatpush1.bf16.msra.mxu1 %v2358_v1  ;;  %v2199_v59 = vpack.c.bf16 %v510_v55, %v507_v54  ;;  %v511_v60 = vld [vmem:[%s3461_s14 + $0x298] sm:$0xff]  ;;  %v509_v62 = vld [vmem:[%s3461_s14 + $0x288] sm:$0xff]  ;;  %v516_v1 = vld [vmem:[%s3461_s14 + $0x2c0] sm:$0xff] }
  0xb4   : > { %2174 = vmatpush1.bf16.msra.mxu0 %v2173_v2  ;;  %2360 = vmatprep.subr.bf16.mxu1 %v3151_v0  ;;  %v513_v63 = vld [vmem:[%s3461_s14 + $0x2a8] sm:$0xff]  ;;  %v2379_v2 = vpack.c.bf16 %v511_v60, %v508_v58  ;;  %v2201_v3 = vpack.c.bf16 %v509_v62, %v506_v61  ;;  %v512_v7 = vld [vmem:[%s3461_s14 + $0x2a0] sm:$0xff]  ;;  %v515_v8 = vld [vmem:[%s3461_s14 + $0x2b8] sm:$0xff] }
  0xb5   : > { %2176 = vmatprep.subr.bf16.mxu0 %v2175_v4  ;;  %v514_v4 = vld [vmem:[%s3461_s14 + $0x2b0] sm:$0xff]  ;;  %v2203_v5 = vpack.c.bf16 %v516_v1, %v513_v63  ;;  %v517_v6 = vld [vmem:[%s3461_s14 + $0x2c8] sm:$0xff]  ;;  %v519_v9 = vld [vmem:[%s3461_s14 + $0x2d8] sm:$0xff]  ;;  %v2205_v12 = vpack.c.bf16 %v515_v8, %v512_v7 }
  0xb6   : > { %v523_v15 = vld [vmem:[%s3461_s14 + $0x2f8] sm:$0xff]  ;;  %v518_v16 = vld [vmem:[%s3461_s14 + $0x2d0] sm:$0xff]  ;;  %v521_v17 = vld [vmem:[%s3461_s14 + $0x2e8] sm:$0xff] }
  0xb7   : > { %2362 = vmatpush1.bf16.msra.mxu1 %v2361_v10  ;;  %v522_v10 = vld [vmem:[%s3461_s14 + $0x2f0] sm:$0xff]  ;;  %v525_v18 = vld [vmem:[%s3461_s14 + $0x308] sm:$0xff]  ;;  %v2209_v21 = vpack.c.bf16 %v521_v17, %v518_v16  ;;  %v527_v24 = vld [vmem:[%s3461_s14 + $0x318] sm:$0xff] }
  0xb8   : > { %2178 = vmatpush1.bf16.msra.mxu0 %v2177_v11  ;;  %2363 = vmatprep.subr.bf16.mxu1 %v3151_v0  ;;  %v2382_v11 = vpack.c.bf16 %v517_v6, %v514_v4  ;;  %v2207_v14 = vpack.c.bf16 %v522_v10, %v519_v9  ;;  %v526_v25 = vld [vmem:[%s3461_s14 + $0x310] sm:$0xff]  ;;  %v529_v26 = vld [vmem:[%s3461_s14 + $0x328] sm:$0xff]  ;;  %v531_v27 = vld [vmem:[%s3461_s14 + $0x338] sm:$0xff] }
  0xb9   : > { %2180 = vmatprep.subr.bf16.mxu0 %v2179_v13  ;;  %v520_v13 = vld [vmem:[%s3461_s14 + $0x2e0] sm:$0xff]  ;;  %v534_v28 = vld [vmem:[%s3461_s14 + $0x350] sm:$0xff]  ;;  %v291_v31 = vld [vmem:[%s3451_s21 + $0x38] sm:$0xff] }
  0xba   : > { %v530_v33 = vld [vmem:[%s3461_s14 + $0x330] sm:$0xff]  ;;  %v2215_v34 = vpack.c.bf16 %v534_v28, %v531_v27  ;;  %v533_v35 = vld [vmem:[%s3461_s14 + $0x348] sm:$0xff]  ;;  %v532_v36 = vld [vmem:[%s3461_s14 + $0x340] sm:$0xff] }
  0xbb   : > { %2365 = vmatpush1.bf16.msra.mxu1 %v2364_v19  ;;  %v528_v19 = vld [vmem:[%s3461_s14 + $0x320] sm:$0xff]  ;;  %v535_v37 = vld [vmem:[%s3461_s14 + $0x358] sm:$0xff]  ;;  %v290_v40 = vld [vmem:[%s3451_s21 + $0x30] sm:$0xff]  ;;  %v2217_v42 = vpack.c.bf16 %v533_v35, %v530_v33 }
  0xbc   : > { %2182 = vmatpush1.bf16.msra.mxu0 %v2181_v20  ;;  %2366 = vmatprep.subr.bf16.mxu1 %v3151_v0  ;;  %v2385_v20 = vpack.c.bf16 %v523_v15, %v520_v13  ;;  %v2211_v22 = vpack.c.bf16 %v528_v19, %v525_v18  ;;  %v2391_v43 = vpack.c.bf16 %v535_v37, %v532_v36  ;;  %v536_v44 = vld [vmem:[%s3461_s14 + $0x360] sm:$0xff]  ;;  %v539_v46 = vld [vmem:[%s3461_s14 + $0x378] sm:$0xff]  ;;  %v542_v55 = vld [vmem:[%s3461_s14 + $0x390] sm:$0xff] }
  0xbd   : > { %2184 = vmatprep.subr.bf16.mxu0 %v2183_v23  ;;  %v524_v23 = vld [vmem:[%s3461_s14 + $0x300] sm:$0xff]  ;;  %v543_v49 = vld [vmem:[%s3461_s14 + $0x398] sm:$0xff]  ;;  %v2221_v53 = vpack.c.bf16 %v539_v46, %v536_v44  ;;  %v549_v60 = vld [vmem:[%s3461_s14 + $0x3c8] sm:$0xff] }
  0xbe   : > { %v296_v51 = vld [vmem:[%s3451_s21 + $0x60] sm:$0xff]  ;;  %v303_v52 = vld [vmem:[%s3451_s21 + $0x98] sm:$0xff]  ;;  %v302_v62 = vld [vmem:[%s3451_s21 + $0x90] sm:$0xff] }
  0xbf   : > { %2368 = vmatpush1.bf16.msra.mxu1 %v2367_v29  ;;  %v284_v29 = vld [vmem:[%s3451_s21] sm:$0xff]  ;;  %v309_v63 = vld [vmem:[%s3451_s21 + $0xc8] sm:$0xff]  ;;  %v550_v6 = vld [vmem:[%s3461_s14 + $0x3d0] sm:$0xff] }
  0xc0   : > { %2186 = vmatpush1.bf16.msra.mxu0 %v2185_v30  ;;  %2369 = vmatprep.subr.bf16.mxu1 %v3151_v0  ;;  %v2213_v30 = vpack.c.bf16 %v527_v24, %v524_v23  ;;  %v544_v58 = vld [vmem:[%s3461_s14 + $0x3a0] sm:$0xff]  ;;  %v553_v7 = vld [vmem:[%s3461_s14 + $0x3e8] sm:$0xff]  ;;  %v555_v8 = vld [vmem:[%s3461_s14 + $0x3f8] sm:$0xff] }
  0xc1   : > { %2188 = vmatprep.subr.bf16.mxu0 %v2187_v32  ;;  %v2388_v32 = vpack.c.bf16 %v529_v26, %v526_v25  ;;  %v552_v61 = vld [vmem:[%s3461_s14 + $0x3e0] sm:$0xff]  ;;  %v558_v9 = vld [vmem:[%s3461_s14 + $0x410] sm:$0xff]  ;;  %v2400_v13 = vpack.c.bf16 %v553_v7, %v550_v6  ;;  %v557_v16 = vld [vmem:[%s3461_s14 + $0x408] sm:$0xff] }
  0xc2   : > { %v2227_v4 = vpack.c.bf16 %v552_v61, %v549_v60  ;;  %v308_v10 = vld [vmem:[%s3451_s21 + $0xc0] sm:$0xff]  ;;  %v2231_v15 = vpack.c.bf16 %v558_v9, %v555_v8  ;;  %v559_v18 = vld [vmem:[%s3461_s14 + $0x418] sm:$0xff]  ;;  %v561_v19 = vld [vmem:[%s3461_s14 + $0x428] sm:$0xff] }
  0xc3   : > { %2371 = vmatpush1.bf16.msra.mxu1 %v2370_v38  ;;  %v537_v38 = vld [vmem:[%s3461_s14 + $0x368] sm:$0xff]  ;;  %v556_v17 = vld [vmem:[%s3461_s14 + $0x400] sm:$0xff]  ;;  %v563_v27 = vld [vmem:[%s3461_s14 + $0x438] sm:$0xff] }
  0xc4   : > { %2190 = vmatpush1.bf16.msra.mxu0 %v2189_v39  ;;  %2372 = vmatprep.subr.bf16.mxu1 %v3151_v0  ;;  %v540_v39 = vld [vmem:[%s3461_s14 + $0x380] sm:$0xff]  ;;  %v2403_v24 = vpack.c.bf16 %v559_v18, %v556_v17  ;;  %v562_v28 = vld [vmem:[%s3461_s14 + $0x430] sm:$0xff]  ;;  %v327_v33 = vld [vmem:[%s3451_s21 + $0x158] sm:$0xff] }
  0xc5   : > { %2192 = vmatprep.subr.bf16.mxu0 %v2191_v41  ;;  %v297_v41 = vld [vmem:[%s3451_s21 + $0x68] sm:$0xff]  ;;  %v2219_v45 = vpack.c.bf16 %v540_v39, %v537_v38  ;;  %v560_v25 = vld [vmem:[%s3461_s14 + $0x420] sm:$0xff]  ;;  %v566_v36 = vld [vmem:[%s3461_s14 + $0x450] sm:$0xff] }
  0xc6   : > { %v569_v38 = vld [vmem:[%s3461_s14 + $0x468] sm:$0xff]  ;;  %v568_v39 = vld [vmem:[%s3461_s14 + $0x460] sm:$0xff]  ;;  %v587_v8 = vld [vmem:[%s3461_s14 + $0x4f8] sm:$0xff] }
  0xc7   : > { %2374 = vmatpush1.bf16.msra.mxu1 %v2373_v47  ;;  %v538_v47 = vld [vmem:[%s3461_s14 + $0x370] sm:$0xff]  ;;  %v333_v44 = vld [vmem:[%s3451_s21 + $0x188] sm:$0xff]  ;;  %v580_v61 = vld [vmem:[%s3461_s14 + $0x4c0] sm:$0xff] }
  0xc8   : > { %2194 = vmatpush1.bf16.msra.mxu0 %v2193_v48  ;;  %2375 = vmatprep.subr.bf16.mxu1 %v3151_v0  ;;  %v541_v48 = vld [vmem:[%s3461_s14 + $0x388] sm:$0xff]  ;;  %v584_v6 = vld [vmem:[%s3461_s14 + $0x4e0] sm:$0xff]  ;;  %v586_v9 = vld [vmem:[%s3461_s14 + $0x4f0] sm:$0xff] }
  0xc9   : > { %2196 = vmatprep.subr.bf16.mxu0 %v2195_v50  ;;  %v546_v50 = vld [vmem:[%s3461_s14 + $0x3b0] sm:$0xff]  ;;  %v2394_v54 = vpack.c.bf16 %v541_v48, %v538_v47  ;;  %v572_v47 = vld [vmem:[%s3461_s14 + $0x480] sm:$0xff]  ;;  %v581_v60 = vld [vmem:[%s3461_s14 + $0x4c8] sm:$0xff] }
  0xca   : > { %v590_v17 = vld [vmem:[%s3461_s14 + $0x510] sm:$0xff] }
  0xcb   : > { %2377 = vmatpush1.bf16.msra.mxu1 %v2376_v56  ;;  %v2223_v56 = vpack.c.bf16 %v546_v50, %v543_v49  ;;  %v575_v49 = vld [vmem:[%s3461_s14 + $0x498] sm:$0xff]  ;;  %v574_v50 = vld [vmem:[%s3461_s14 + $0x490] sm:$0xff] }
  0xcc   : > { %2198 = vmatpush1.bf16.msra.mxu0 %v2197_v57  ;;  %2378 = vmatprep.subr.bf16.mxu1 %v3151_v0  ;;  %v545_v57 = vld [vmem:[%s3461_s14 + $0x3a8] sm:$0xff] }
  0xcd   : > { %2200 = vmatprep.subr.bf16.mxu0 %v2199_v59  ;;  %v547_v59 = vld [vmem:[%s3461_s14 + $0x3b8] sm:$0xff]  ;;  %v2225_v1 = vpack.c.bf16 %v545_v57, %v542_v55 }
  0xce   : > { %v339_v55 = vld [vmem:[%s3451_s21 + $0x1b8] sm:$0xff] }
  0xcf   : > { %2380 = vmatpush1.bf16.msra.mxu1 %v2379_v2  ;;  %v2397_v2 = vpack.c.bf16 %v547_v59, %v544_v58  ;;  %v578_v58 = vld [vmem:[%s3461_s14 + $0x4b0] sm:$0xff] }
  0xd0   : > { %2202 = vmatpush1.bf16.msra.mxu0 %v2201_v3  ;;  %2381 = vmatprep.subr.bf16.mxu1 %v3151_v0  ;;  %v548_v3 = vld [vmem:[%s3461_s14 + $0x3c0] sm:$0xff] }
  0xd1   : > { %2204 = vmatprep.subr.bf16.mxu0 %v2203_v5  ;;  %v551_v5 = vld [vmem:[%s3461_s14 + $0x3d8] sm:$0xff] }
  0xd3   : > { %2383 = vmatpush1.bf16.msra.mxu1 %v2382_v11  ;;  %v315_v11 = vld [vmem:[%s3451_s21 + $0xf8] sm:$0xff] }
  0xd4   : > { %2206 = vmatpush1.bf16.msra.mxu0 %v2205_v12  ;;  %2384 = vmatprep.subr.bf16.mxu1 %v3151_v0  ;;  %v2229_v12 = vpack.c.bf16 %v551_v5, %v548_v3  ;;  %v345_v3 = vld [vmem:[%s3451_s21 + $0x1e8] sm:$0xff] }
  0xd5   : > { %2208 = vmatprep.subr.bf16.mxu0 %v2207_v14  ;;  %v554_v14 = vld [vmem:[%s3461_s14 + $0x3f0] sm:$0xff] }
  0xd6   : > { %v2233_v23 = vpack.c.bf16 %v557_v16, %v554_v14  ;;  %v351_v14 = vld [vmem:[%s3451_s21 + $0x218] sm:$0xff] }
  0xd7   : > { %2386 = vmatpush1.bf16.msra.mxu1 %v2385_v20  ;;  %v564_v20 = vld [vmem:[%s3461_s14 + $0x440] sm:$0xff] }
  0xd8   : > { %2210 = vmatpush1.bf16.msra.mxu0 %v2209_v21  ;;  %2387 = vmatprep.subr.bf16.mxu1 %v3151_v0  ;;  %v314_v21 = vld [vmem:[%s3451_s21 + $0xf0] sm:$0xff]  ;;  %v2235_v26 = vpack.c.bf16 %v564_v20, %v561_v19  ;;  %v593_v19 = vld [vmem:[%s3461_s14 + $0x528] sm:$0xff]  ;;  %v592_v20 = vld [vmem:[%s3461_s14 + $0x520] sm:$0xff] }
  0xd9   : > { %2212 = vmatprep.subr.bf16.mxu0 %v2211_v22  ;;  %v321_v22 = vld [vmem:[%s3451_s21 + $0x128] sm:$0xff] }
  0xda   : > { %1425 = vmatmul.mubr.f32.vlgmr.msra.gmra.mrb[0].mxu1 %v284_v29 }
  0xdb   : > { %798 = vmatmul.mubr.f32.vlgmr.msra.gmra.mrb[0].mxu0 %v284_v29  ;;  %1429 = vmatprep.mubr.f32.mxu1 %v291_v31  ;;  %v565_v29 = vld [vmem:[%s3461_s14 + $0x448] sm:$0xff] }
  0xdc   : > { %2214 = vmatpush1.bf16.msra.mxu0 %v2213_v30  ;;  %2389 = vmatpush1.bf16.msra.mxu1 %v2388_v32  ;;  %v567_v30 = vld [vmem:[%s3461_s14 + $0x458] sm:$0xff]  ;;  %v320_v32 = vld [vmem:[%s3451_s21 + $0x120] sm:$0xff]  ;;  %v2406_v35 = vpack.c.bf16 %v565_v29, %v562_v28 }
  0xdd   : > { %803 = vmatprep.mubr.f32.mxu0 %v291_v31  ;;  %2216 = vmatprep.subr.bf16.mxu0 %v2215_v34  ;;  %v570_v31 = vld [vmem:[%s3461_s14 + $0x470] sm:$0xff]  ;;  %v2237_v34 = vpack.c.bf16 %v563_v27, %v560_v25  ;;  %v357_v25 = vld [vmem:[%s3451_s21 + $0x248] sm:$0xff]  ;;  %v596_v28 = vld [vmem:[%s3461_s14 + $0x540] sm:$0xff] }
  0xde   : > { %2390 = vmatprep.subr.bf16.mxu1 %v3151_v0  ;;  %1430 = vmatmul.mubr.f32.gmra.mrb[2].mxu1 %v290_v40  ;;  %v2239_v37 = vpack.c.bf16 %v570_v31, %v567_v30  ;;  %v599_v30 = vld [vmem:[%s3461_s14 + $0x558] sm:$0xff]  ;;  %v598_v31 = vld [vmem:[%s3461_s14 + $0x550] sm:$0xff] }
  0xdf   : > { %804 = vmatmul.mubr.f32.gmra.mrb[2].mxu0 %v290_v40  ;;  %1434 = vmatprep.mubr.f32.mxu1 %v297_v41  ;;  %v571_v40 = vld [vmem:[%s3461_s14 + $0x478] sm:$0xff] }
  0xe0   : > { %809 = vmatprep.mubr.f32.mxu0 %v297_v41  ;;  %2218 = vmatpush1.bf16.msra.mxu0 %v2217_v42  ;;  %v573_v41 = vld [vmem:[%s3461_s14 + $0x488] sm:$0xff]  ;;  %v576_v42 = vld [vmem:[%s3461_s14 + $0x4a0] sm:$0xff]  ;;  %v2409_v46 = vpack.c.bf16 %v571_v40, %v568_v39  ;;  %v602_v39 = vld [vmem:[%s3461_s14 + $0x570] sm:$0xff] }
  0xe1   : > { %2392 = vmatpush1.bf16.msra.mxu1 %v2391_v43  ;;  %2220 = vmatprep.subr.bf16.mxu0 %v2219_v45  ;;  %v326_v43 = vld [vmem:[%s3451_s21 + $0x150] sm:$0xff]  ;;  %v2241_v45 = vpack.c.bf16 %v569_v38, %v566_v36  ;;  %v2243_v48 = vpack.c.bf16 %v576_v42, %v573_v41  ;;  %v363_v36 = vld [vmem:[%s3451_s21 + $0x278] sm:$0xff]  ;;  %v605_v41 = vld [vmem:[%s3461_s14 + $0x588] sm:$0xff] }
  0xe2   : > { %2393 = vmatprep.subr.bf16.mxu1 %v3151_v0  ;;  %1435 = vmatmul.mubr.f32.gmra.mrb[4].mxu1 %v296_v51  ;;  %v604_v42 = vld [vmem:[%s3461_s14 + $0x580] sm:$0xff] }
  0xe3   : > { %810 = vmatmul.mubr.f32.gmra.mrb[4].mxu0 %v296_v51  ;;  %1439 = vmatprep.mubr.f32.mxu1 %v303_v52  ;;  %v577_v51 = vld [vmem:[%s3461_s14 + $0x4a8] sm:$0xff] }
  0xe4   : > { %815 = vmatprep.mubr.f32.mxu0 %v303_v52  ;;  %2222 = vmatpush1.bf16.msra.mxu0 %v2221_v53  ;;  %v579_v52 = vld [vmem:[%s3461_s14 + $0x4b8] sm:$0xff]  ;;  %v582_v53 = vld [vmem:[%s3461_s14 + $0x4d0] sm:$0xff]  ;;  %v2412_v57 = vpack.c.bf16 %v577_v51, %v574_v50  ;;  %v608_v50 = vld [vmem:[%s3461_s14 + $0x5a0] sm:$0xff] }
  0xe5   : > { %2395 = vmatpush1.bf16.msra.mxu1 %v2394_v54  ;;  %2224 = vmatprep.subr.bf16.mxu0 %v2223_v56  ;;  %v332_v54 = vld [vmem:[%s3451_s21 + $0x180] sm:$0xff]  ;;  %v2245_v56 = vpack.c.bf16 %v575_v49, %v572_v47  ;;  %v2247_v59 = vpack.c.bf16 %v582_v53, %v579_v52  ;;  %v369_v47 = vld [vmem:[%s3451_s21 + $0x2a8] sm:$0xff]  ;;  %v611_v52 = vld [vmem:[%s3461_s14 + $0x5b8] sm:$0xff] }
  0xe6   : > { %2396 = vmatprep.subr.bf16.mxu1 %v3151_v0  ;;  %1440 = vmatmul.mubr.f32.gmra.mrb[6].mxu1 %v302_v62  ;;  %v610_v53 = vld [vmem:[%s3461_s14 + $0x5b0] sm:$0xff] }
  0xe7   : > { %816 = vmatmul.mubr.f32.gmra.mrb[6].mxu0 %v302_v62  ;;  %1444 = vmatprep.mubr.f32.mxu1 %v309_v63  ;;  %v583_v62 = vld [vmem:[%s3461_s14 + $0x4d8] sm:$0xff] }
  0xe8   : > { %821 = vmatprep.mubr.f32.mxu0 %v309_v63  ;;  %2226 = vmatpush1.bf16.msra.mxu0 %v2225_v1  ;;  %v585_v63 = vld [vmem:[%s3461_s14 + $0x4e8] sm:$0xff]  ;;  %v588_v1 = vld [vmem:[%s3461_s14 + $0x500] sm:$0xff]  ;;  %v2415_v5 = vpack.c.bf16 %v583_v62, %v580_v61  ;;  %v614_v61 = vld [vmem:[%s3461_s14 + $0x5d0] sm:$0xff] }
  0xe9   : > { %2398 = vmatpush1.bf16.msra.mxu1 %v2397_v2  ;;  %2228 = vmatprep.subr.bf16.mxu0 %v2227_v4  ;;  %v338_v2 = vld [vmem:[%s3451_s21 + $0x1b0] sm:$0xff]  ;;  %v2249_v4 = vpack.c.bf16 %v581_v60, %v578_v58  ;;  %v2251_v7 = vpack.c.bf16 %v588_v1, %v585_v63  ;;  %v375_v58 = vld [vmem:[%s3451_s21 + $0x2d8] sm:$0xff]  ;;  %v617_v63 = vld [vmem:[%s3461_s14 + $0x5e8] sm:$0xff] }
  0xea   : > { %2399 = vmatprep.subr.bf16.mxu1 %v3151_v0  ;;  %1445 = vmatmul.mubr.f32.gmra.mrb[8].mxu1 %v308_v10  ;;  %v616_v1 = vld [vmem:[%s3461_s14 + $0x5e0] sm:$0xff] }
  0xeb   : > { %822 = vmatmul.mubr.f32.gmra.mrb[8].mxu0 %v308_v10  ;;  %1449 = vmatprep.mubr.f32.mxu1 %v315_v11  ;;  %v589_v10 = vld [vmem:[%s3461_s14 + $0x508] sm:$0xff] }
  0xec   : > { %827 = vmatprep.mubr.f32.mxu0 %v315_v11  ;;  %2230 = vmatpush1.bf16.msra.mxu0 %v2229_v12  ;;  %v591_v11 = vld [vmem:[%s3461_s14 + $0x518] sm:$0xff]  ;;  %v594_v12 = vld [vmem:[%s3461_s14 + $0x530] sm:$0xff]  ;;  %v2418_v16 = vpack.c.bf16 %v589_v10, %v586_v9  ;;  %v380_v10 = vld [vmem:[%s3451_s21 + $0x300] sm:$0xff] }
  0xed   : > { %2401 = vmatpush1.bf16.msra.mxu1 %v2400_v13  ;;  %2232 = vmatprep.subr.bf16.mxu0 %v2231_v15  ;;  %v344_v13 = vld [vmem:[%s3451_s21 + $0x1e0] sm:$0xff]  ;;  %v2253_v15 = vpack.c.bf16 %v587_v8, %v584_v6  ;;  %v2255_v18 = vpack.c.bf16 %v594_v12, %v591_v11  ;;  %v381_v6 = vld [vmem:[%s3451_s21 + $0x308] sm:$0xff]  ;;  %v387_v11 = vld [vmem:[%s3451_s21 + $0x338] sm:$0xff] }
  0xee   : > { %2402 = vmatprep.subr.bf16.mxu1 %v3151_v0  ;;  %1450 = vmatmul.mubr.f32.gmra.mrb[10].mxu1 %v314_v21  ;;  %v386_v12 = vld [vmem:[%s3451_s21 + $0x330] sm:$0xff] }
  0xef   : > { %828 = vmatmul.mubr.f32.gmra.mrb[10].mxu0 %v314_v21  ;;  %1454 = vmatprep.mubr.f32.mxu1 %v321_v22  ;;  %v595_v21 = vld [vmem:[%s3461_s14 + $0x538] sm:$0xff] }
  0xf0   : > { %833 = vmatprep.mubr.f32.mxu0 %v321_v22  ;;  %2234 = vmatpush1.bf16.msra.mxu0 %v2233_v23  ;;  %v597_v22 = vld [vmem:[%s3461_s14 + $0x548] sm:$0xff]  ;;  %v600_v23 = vld [vmem:[%s3461_s14 + $0x560] sm:$0xff]  ;;  %v2421_v27 = vpack.c.bf16 %v595_v21, %v592_v20  ;;  %v410_v20 = vld [vmem:[%s3451_s21 + $0x3f0] sm:$0xff] }
  0xf1   : > { %2404 = vmatpush1.bf16.msra.mxu1 %v2403_v24  ;;  %2236 = vmatprep.subr.bf16.mxu0 %v2235_v26  ;;  %v350_v24 = vld [vmem:[%s3451_s21 + $0x210] sm:$0xff]  ;;  %v2257_v26 = vpack.c.bf16 %v593_v19, %v590_v17  ;;  %v2259_v29 = vpack.c.bf16 %v600_v23, %v597_v22  ;;  %v405_v17 = vld [vmem:[%s3451_s21 + $0x3c8] sm:$0xff]  ;;  %v411_v19 = vld [vmem:[%s3451_s21 + $0x3f8] sm:$0xff] }
  0xf2   : > { %2405 = vmatprep.subr.bf16.mxu1 %v3151_v0  ;;  %1455 = vmatmul.mubr.f32.gmra.mrb[12].mxu1 %v320_v32  ;;  %v417_v21 = vld [vmem:[%s3451_s21 + $0x428] sm:$0xff]  ;;  %v416_v22 = vld [vmem:[%s3451_s21 + $0x420] sm:$0xff]  ;;  %v423_v23 = vld [vmem:[%s3451_s21 + $0x458] sm:$0xff] }
  0xf3   : > { %834 = vmatmul.mubr.f32.gmra.mrb[12].mxu0 %v320_v32  ;;  %1459 = vmatprep.mubr.f32.mxu1 %v327_v33  ;;  %v601_v32 = vld [vmem:[%s3461_s14 + $0x568] sm:$0xff] }
  0xf4   : > { %839 = vmatprep.mubr.f32.mxu0 %v327_v33  ;;  %2238 = vmatpush1.bf16.msra.mxu0 %v2237_v34  ;;  %v603_v33 = vld [vmem:[%s3461_s14 + $0x578] sm:$0xff]  ;;  %v606_v34 = vld [vmem:[%s3461_s14 + $0x590] sm:$0xff]  ;;  %v2424_v38 = vpack.c.bf16 %v601_v32, %v598_v31 }
  0xf5   : > { %2407 = vmatpush1.bf16.msra.mxu1 %v2406_v35  ;;  %2240 = vmatprep.subr.bf16.mxu0 %v2239_v37  ;;  %v356_v35 = vld [vmem:[%s3451_s21 + $0x240] sm:$0xff]  ;;  %v2261_v37 = vpack.c.bf16 %v599_v30, %v596_v28  ;;  %v2263_v40 = vpack.c.bf16 %v606_v34, %v603_v33  ;;  %v622_v28 = vld [vmem:[%s3461_s14 + $0x610] sm:$0xff]  ;;  %v627_v30 = vld [vmem:[%s3461_s14 + $0x638] sm:$0xff] }
  0xf6   : > { %2408 = vmatprep.subr.bf16.mxu1 %v3151_v0  ;;  %1460 = vmatmul.mubr.f32.gmra.mrb[14].mxu1 %v326_v43  ;;  %v630_v31 = vld [vmem:[%s3461_s14 + $0x650] sm:$0xff]  ;;  %v293_v34 = vld [vmem:[%s3451_s21 + $0x48] sm:$0xff] }
  0xf7   : > { %840 = vmatmul.mubr.f32.gmra.mrb[14].mxu0 %v326_v43  ;;  %1464 = vmatprep.mubr.f32.mxu1 %v333_v44  ;;  %v607_v43 = vld [vmem:[%s3461_s14 + $0x598] sm:$0xff]  ;;  %v286_v32 = vld [vmem:[%s3451_s21 + $0x10] sm:$0xff] }
  0xf8   : > { %845 = vmatprep.mubr.f32.mxu0 %v333_v44  ;;  %2242 = vmatpush1.bf16.msra.mxu0 %v2241_v45  ;;  %v609_v44 = vld [vmem:[%s3461_s14 + $0x5a8] sm:$0xff]  ;;  %v612_v45 = vld [vmem:[%s3461_s14 + $0x5c0] sm:$0xff]  ;;  %v2427_v49 = vpack.c.bf16 %v607_v43, %v604_v42 }
  0xf9   : > { %2410 = vmatpush1.bf16.msra.mxu1 %v2409_v46  ;;  %2244 = vmatprep.subr.bf16.mxu0 %v2243_v48  ;;  %v362_v46 = vld [vmem:[%s3451_s21 + $0x270] sm:$0xff]  ;;  %v2265_v48 = vpack.c.bf16 %v605_v41, %v602_v39  ;;  %v2267_v51 = vpack.c.bf16 %v612_v45, %v609_v44  ;;  %v628_v39 = vld [vmem:[%s3461_s14 + $0x640] sm:$0xff]  ;;  %v633_v41 = vld [vmem:[%s3461_s14 + $0x668] sm:$0xff] }
  0xfa   : > { %2411 = vmatprep.subr.bf16.mxu1 %v3151_v0  ;;  %1465 = vmatmul.mubr.f32.gmra.mrb[16].mxu1 %v332_v54  ;;  %v636_v42 = vld [vmem:[%s3461_s14 + $0x680] sm:$0xff]  ;;  %v299_v44 = vld [vmem:[%s3451_s21 + $0x78] sm:$0xff] }
  0xfb   : > { %846 = vmatmul.mubr.f32.gmra.mrb[16].mxu0 %v332_v54  ;;  %1469 = vmatprep.mubr.f32.mxu1 %v339_v55  ;;  %v613_v54 = vld [vmem:[%s3461_s14 + $0x5c8] sm:$0xff]  ;;  %v292_v43 = vld [vmem:[%s3451_s21 + $0x40] sm:$0xff] }
  0xfc   : > { %851 = vmatprep.mubr.f32.mxu0 %v339_v55  ;;  %2246 = vmatpush1.bf16.msra.mxu0 %v2245_v56  ;;  %v615_v55 = vld [vmem:[%s3461_s14 + $0x5d8] sm:$0xff]  ;;  %v618_v56 = vld [vmem:[%s3461_s14 + $0x5f0] sm:$0xff]  ;;  %v2430_v60 = vpack.c.bf16 %v613_v54, %v610_v53 }
  0xfd   : > { %2413 = vmatpush1.bf16.msra.mxu1 %v2412_v57  ;;  %2248 = vmatprep.subr.bf16.mxu0 %v2247_v59  ;;  %v368_v57 = vld [vmem:[%s3451_s21 + $0x2a0] sm:$0xff]  ;;  %v2269_v59 = vpack.c.bf16 %v611_v52, %v608_v50  ;;  %v2271_v62 = vpack.c.bf16 %v618_v56, %v615_v55  ;;  %v634_v50 = vld [vmem:[%s3461_s14 + $0x670] sm:$0xff]  ;;  %v639_v52 = vld [vmem:[%s3461_s14 + $0x698] sm:$0xff] }
  0xfe   : > { %2414 = vmatprep.subr.bf16.mxu1 %v3151_v0  ;;  %1470 = vmatmul.mubr.f32.gmra.mrb[18].mxu1 %v338_v2  ;;  %v642_v53 = vld [vmem:[%s3461_s14 + $0x6b0] sm:$0xff]  ;;  %v305_v55 = vld [vmem:[%s3451_s21 + $0xa8] sm:$0xff] }
  0xff   : > { %852 = vmatmul.mubr.f32.gmra.mrb[18].mxu0 %v338_v2  ;;  %1474 = vmatprep.mubr.f32.mxu1 %v345_v3  ;;  %v619_v2 = vld [vmem:[%s3461_s14 + $0x5f8] sm:$0xff]  ;;  %v298_v54 = vld [vmem:[%s3451_s21 + $0x70] sm:$0xff] }
 0x100   : > { %857 = vmatprep.mubr.f32.mxu0 %v345_v3  ;;  %2250 = vmatpush1.bf16.msra.mxu0 %v2249_v4  ;;  %v621_v3 = vld [vmem:[%s3461_s14 + $0x608] sm:$0xff]  ;;  %v624_v4 = vld [vmem:[%s3461_s14 + $0x620] sm:$0xff]  ;;  %v2433_v8 = vpack.c.bf16 %v619_v2, %v616_v1 }
 0x101   : > { %2416 = vmatpush1.bf16.msra.mxu1 %v2415_v5  ;;  %2252 = vmatprep.subr.bf16.mxu0 %v2251_v7  ;;  %v374_v5 = vld [vmem:[%s3451_s21 + $0x2d0] sm:$0xff]  ;;  %v2273_v7 = vpack.c.bf16 %v617_v63, %v614_v61  ;;  %v2275_v9 = vpack.c.bf16 %v624_v4, %v621_v3  ;;  %v640_v61 = vld [vmem:[%s3461_s14 + $0x6a0] sm:$0xff]  ;;  %v645_v63 = vld [vmem:[%s3461_s14 + $0x6c8] sm:$0xff] }
 0x102   : > { %2417 = vmatprep.subr.bf16.mxu1 %v3151_v0  ;;  %1475 = vmatmul.mubr.f32.gmra.mrb[20].mxu1 %v344_v13  ;;  %v648_v1 = vld [vmem:[%s3461_s14 + $0x6e0] sm:$0xff]  ;;  %v311_v3 = vld [vmem:[%s3451_s21 + $0xd8] sm:$0xff] }
 0x103   : > { %858 = vmatmul.mubr.f32.gmra.mrb[20].mxu0 %v344_v13  ;;  %1479 = vmatprep.mubr.f32.mxu1 %v351_v14  ;;  %v393_v13 = vld [vmem:[%s3451_s21 + $0x368] sm:$0xff]  ;;  %v304_v2 = vld [vmem:[%s3451_s21 + $0xa0] sm:$0xff] }
 0x104   : > { %863 = vmatprep.mubr.f32.mxu0 %v351_v14  ;;  %2254 = vmatpush1.bf16.msra.mxu0 %v2253_v15  ;;  %v392_v14 = vld [vmem:[%s3451_s21 + $0x360] sm:$0xff]  ;;  %v399_v15 = vld [vmem:[%s3451_s21 + $0x398] sm:$0xff] }
 0x105   : > { %2419 = vmatpush1.bf16.msra.mxu1 %v2418_v16  ;;  %2256 = vmatprep.subr.bf16.mxu0 %v2255_v18  ;;  %v398_v16 = vld [vmem:[%s3451_s21 + $0x390] sm:$0xff]  ;;  %v404_v18 = vld [vmem:[%s3451_s21 + $0x3c0] sm:$0xff] }
 0x106   : > { %2420 = vmatprep.subr.bf16.mxu1 %v3151_v0  ;;  %1480 = vmatmul.mubr.f32.gmra.mrb[22].mxu1 %v350_v24 }
 0x107   : > { %864 = vmatmul.mubr.f32.gmra.mrb[22].mxu0 %v350_v24  ;;  %1484 = vmatprep.mubr.f32.mxu1 %v357_v25  ;;  %v422_v24 = vld [vmem:[%s3451_s21 + $0x450] sm:$0xff] }
 0x108   : > { %869 = vmatprep.mubr.f32.mxu0 %v357_v25  ;;  %2258 = vmatpush1.bf16.msra.mxu0 %v2257_v26  ;;  %v287_v25 = vld [vmem:[%s3451_s21 + $0x18] sm:$0xff]  ;;  %v620_v26 = vld [vmem:[%s3461_s14 + $0x600] sm:$0xff] }
 0x109   : > { %2422 = vmatpush1.bf16.msra.mxu1 %v2421_v27  ;;  %2260 = vmatprep.subr.bf16.mxu0 %v2259_v29  ;;  %v623_v27 = vld [vmem:[%s3461_s14 + $0x618] sm:$0xff]  ;;  %v625_v29 = vld [vmem:[%s3461_s14 + $0x628] sm:$0xff] }
 0x10a   : > { %2423 = vmatprep.subr.bf16.mxu1 %v3151_v0  ;;  %1485 = vmatmul.mubr.f32.gmra.mrb[24].mxu1 %v356_v35  ;;  %v2277_v33 = vpack.c.bf16 %v623_v27, %v620_v26 }
 0x10b   : > { %870 = vmatmul.mubr.f32.gmra.mrb[24].mxu0 %v356_v35  ;;  %1489 = vmatprep.mubr.f32.mxu1 %v363_v36  ;;  %v2436_v35 = vpack.c.bf16 %v625_v29, %v622_v28  ;;  %v656_v28 = vld [vmem:[%s3461_s14 + $0x720] sm:$0xff] }
 0x10c   : > { %875 = vmatprep.mubr.f32.mxu0 %v363_v36  ;;  %2262 = vmatpush1.bf16.msra.mxu0 %v2261_v37  ;;  %v626_v36 = vld [vmem:[%s3461_s14 + $0x630] sm:$0xff]  ;;  %v2279_v37 = vpack.c.bf16 %v630_v31, %v627_v30  ;;  %v659_v30 = vld [vmem:[%s3461_s14 + $0x738] sm:$0xff] }
 0x10d   : > { %2425 = vmatpush1.bf16.msra.mxu1 %v2424_v38  ;;  %2264 = vmatprep.subr.bf16.mxu0 %v2263_v40  ;;  %v629_v38 = vld [vmem:[%s3461_s14 + $0x648] sm:$0xff]  ;;  %v631_v40 = vld [vmem:[%s3461_s14 + $0x658] sm:$0xff]  ;;  %v658_v31 = vld [vmem:[%s3461_s14 + $0x730] sm:$0xff] }
 0x10e   : > { %2426 = vmatprep.subr.bf16.mxu1 %v3151_v0  ;;  %1490 = vmatmul.mubr.f32.gmra.mrb[26].mxu1 %v362_v46  ;;  %v2281_v45 = vpack.c.bf16 %v629_v38, %v626_v36  ;;  %v329_v36 = vld [vmem:[%s3451_s21 + $0x168] sm:$0xff] }
 0x10f   : > { %876 = vmatmul.mubr.f32.gmra.mrb[26].mxu0 %v362_v46  ;;  %1494 = vmatprep.mubr.f32.mxu1 %v369_v47  ;;  %v2439_v46 = vpack.c.bf16 %v631_v40, %v628_v39  ;;  %v662_v39 = vld [vmem:[%s3461_s14 + $0x750] sm:$0xff] }
 0x110   : > { %881 = vmatprep.mubr.f32.mxu0 %v369_v47  ;;  %2266 = vmatpush1.bf16.msra.mxu0 %v2265_v48  ;;  %v632_v47 = vld [vmem:[%s3461_s14 + $0x660] sm:$0xff]  ;;  %v2283_v48 = vpack.c.bf16 %v636_v42, %v633_v41  ;;  %v665_v41 = vld [vmem:[%s3461_s14 + $0x768] sm:$0xff] }
 0x111   : > { %2428 = vmatpush1.bf16.msra.mxu1 %v2427_v49  ;;  %2268 = vmatprep.subr.bf16.mxu0 %v2267_v51  ;;  %v635_v49 = vld [vmem:[%s3461_s14 + $0x678] sm:$0xff]  ;;  %v637_v51 = vld [vmem:[%s3461_s14 + $0x688] sm:$0xff]  ;;  %v664_v42 = vld [vmem:[%s3461_s14 + $0x760] sm:$0xff] }
 0x112   : > { %2429 = vmatprep.subr.bf16.mxu1 %v3151_v0  ;;  %1495 = vmatmul.mubr.f32.gmra.mrb[28].mxu1 %v368_v57  ;;  %v2285_v56 = vpack.c.bf16 %v635_v49, %v632_v47  ;;  %v335_v47 = vld [vmem:[%s3451_s21 + $0x198] sm:$0xff] }
 0x113   : > { %882 = vmatmul.mubr.f32.gmra.mrb[28].mxu0 %v368_v57  ;;  %1499 = vmatprep.mubr.f32.mxu1 %v375_v58  ;;  %v2442_v57 = vpack.c.bf16 %v637_v51, %v634_v50  ;;  %v668_v50 = vld [vmem:[%s3461_s14 + $0x780] sm:$0xff] }
 0x114   : > { %887 = vmatprep.mubr.f32.mxu0 %v375_v58  ;;  %2270 = vmatpush1.bf16.msra.mxu0 %v2269_v59  ;;  %v638_v58 = vld [vmem:[%s3461_s14 + $0x690] sm:$0xff]  ;;  %v2287_v59 = vpack.c.bf16 %v642_v53, %v639_v52  ;;  %v671_v52 = vld [vmem:[%s3461_s14 + $0x798] sm:$0xff] }
 0x115   : > { %2431 = vmatpush1.bf16.msra.mxu1 %v2430_v60  ;;  %2272 = vmatprep.subr.bf16.mxu0 %v2271_v62  ;;  %v641_v60 = vld [vmem:[%s3461_s14 + $0x6a8] sm:$0xff]  ;;  %v643_v62 = vld [vmem:[%s3461_s14 + $0x6b8] sm:$0xff]  ;;  %v670_v53 = vld [vmem:[%s3461_s14 + $0x790] sm:$0xff] }
 0x116   : > { %2432 = vmatprep.subr.bf16.mxu1 %v3151_v0  ;;  %1500 = vmatmul.mubr.f32.gmra.mrb[30].mxu1 %v374_v5  ;;  %v2289_v4 = vpack.c.bf16 %v641_v60, %v638_v58  ;;  %v341_v58 = vld [vmem:[%s3451_s21 + $0x1c8] sm:$0xff] }
 0x117   : > { %888 = vmatmul.mubr.f32.gmra.mrb[30].mxu0 %v374_v5  ;;  %1504 = vmatprep.mubr.f32.mxu1 %v381_v6  ;;  %v2445_v5 = vpack.c.bf16 %v643_v62, %v640_v61  ;;  %v674_v61 = vld [vmem:[%s3461_s14 + $0x7b0] sm:$0xff] }
 0x118   : > { %893 = vmatprep.mubr.f32.mxu0 %v381_v6  ;;  %2274 = vmatpush1.bf16.msra.mxu0 %v2273_v7  ;;  %v644_v6 = vld [vmem:[%s3461_s14 + $0x6c0] sm:$0xff]  ;;  %v2291_v7 = vpack.c.bf16 %v648_v1, %v645_v63  ;;  %v677_v63 = vld [vmem:[%s3461_s14 + $0x7c8] sm:$0xff] }
 0x119   : > { %2434 = vmatpush1.bf16.msra.mxu1 %v2433_v8  ;;  %2276 = vmatprep.subr.bf16.mxu0 %v2275_v9  ;;  %v647_v8 = vld [vmem:[%s3461_s14 + $0x6d8] sm:$0xff]  ;;  %v646_v9 = vld [vmem:[%s3461_s14 + $0x6d0] sm:$0xff]  ;;  %v676_v1 = vld [vmem:[%s3461_s14 + $0x7c0] sm:$0xff] }
 0x11a   : > { %2435 = vmatprep.subr.bf16.mxu1 %v3151_v0  ;;  %1505 = vmatmul.mubr.f32.gmra.mrb[32].mxu1 %v380_v10 }
 0x11b   : > { %894 = vmatmul.mubr.f32.gmra.mrb[32].mxu0 %v380_v10  ;;  %1509 = vmatprep.mubr.f32.mxu1 %v387_v11  ;;  %v649_v10 = vld [vmem:[%s3461_s14 + $0x6e8] sm:$0xff] }
 0x11c   : > { %899 = vmatprep.mubr.f32.mxu0 %v387_v11  ;;  %v651_v11 = vld [vmem:[%s3461_s14 + $0x6f8] sm:$0xff] }
 0x11e   : > { %1510 = vmatmul.mubr.f32.gmra.mrb[34].mxu1 %v386_v12 }
 0x11f   : > { %900 = vmatmul.mubr.f32.gmra.mrb[34].mxu0 %v386_v12  ;;  %1514 = vmatprep.mubr.f32.mxu1 %v393_v13  ;;  %v654_v12 = vld [vmem:[%s3461_s14 + $0x710] sm:$0xff] }
 0x120   : > { %905 = vmatprep.mubr.f32.mxu0 %v393_v13  ;;  %v310_v13 = vld [vmem:[%s3451_s21 + $0xd0] sm:$0xff] }
 0x122   : > { %1515 = vmatmul.mubr.f32.gmra.mrb[36].mxu1 %v392_v14 }
 0x123   : > { %906 = vmatmul.mubr.f32.gmra.mrb[36].mxu0 %v392_v14  ;;  %1519 = vmatprep.mubr.f32.mxu1 %v399_v15  ;;  %v317_v14 = vld [vmem:[%s3451_s21 + $0x108] sm:$0xff] }
 0x124   : > { %911 = vmatprep.mubr.f32.mxu0 %v399_v15  ;;  %v2293_v15 = vpack.c.bf16 %v647_v8, %v644_v6  ;;  %v347_v6 = vld [vmem:[%s3451_s21 + $0x1f8] sm:$0xff] }
 0x126   : > { %1520 = vmatmul.mubr.f32.gmra.mrb[38].mxu1 %v398_v16 }
 0x127   : > { %912 = vmatmul.mubr.f32.gmra.mrb[38].mxu0 %v398_v16  ;;  %1524 = vmatprep.mubr.f32.mxu1 %v405_v17  ;;  %v2448_v16 = vpack.c.bf16 %v649_v10, %v646_v9  ;;  %v680_v9 = vld [vmem:[%s3461_s14 + $0x7e0] sm:$0xff] }
 0x128   : > { %917 = vmatprep.mubr.f32.mxu0 %v405_v17  ;;  %v650_v17 = vld [vmem:[%s3461_s14 + $0x6f0] sm:$0xff] }
 0x12a   : > { %1525 = vmatmul.mubr.f32.gmra.mrb[40].mxu1 %v404_v18 }
 0x12b   : > { %918 = vmatmul.mubr.f32.gmra.mrb[40].mxu0 %v404_v18  ;;  %1529 = vmatprep.mubr.f32.mxu1 %v411_v19  ;;  %v2295_v18 = vpack.c.bf16 %v654_v12, %v651_v11  ;;  %v683_v11 = vld [vmem:[%s3461_s14 + $0x7f8] sm:$0xff]  ;;  %v682_v12 = vld [vmem:[%s3461_s14 + $0x7f0] sm:$0xff] }
 0x12c   : > { %923 = vmatprep.mubr.f32.mxu0 %v411_v19  ;;  %v653_v19 = vld [vmem:[%s3461_s14 + $0x708] sm:$0xff] }
 0x12d   : > { %v2297_v26 = vpack.c.bf16 %v653_v19, %v650_v17  ;;  %v353_v17 = vld [vmem:[%s3451_s21 + $0x228] sm:$0xff] }
 0x12e   : > { %1530 = vmatmul.mubr.f32.gmra.mrb[42].mxu1 %v410_v20 }
 0x12f   : > { %924 = vmatmul.mubr.f32.gmra.mrb[42].mxu0 %v410_v20  ;;  %1534 = vmatprep.mubr.f32.mxu1 %v417_v21  ;;  %v652_v20 = vld [vmem:[%s3461_s14 + $0x700] sm:$0xff] }
 0x130   : > { %929 = vmatprep.mubr.f32.mxu0 %v417_v21  ;;  %v655_v21 = vld [vmem:[%s3461_s14 + $0x718] sm:$0xff] }
 0x131   : > { %v2451_v27 = vpack.c.bf16 %v655_v21, %v652_v20  ;;  %v686_v20 = vld [vmem:[%s3461_s14 + $0x810] sm:$0xff] }
 0x132   : > { %1535 = vmatmul.mubr.f32.gmra.mrb[44].mxu1 %v416_v22 }
 0x133   : > { %930 = vmatmul.mubr.f32.gmra.mrb[44].mxu0 %v416_v22  ;;  %1539 = vmatprep.mubr.f32.mxu1 %v423_v23  ;;  %v657_v22 = vld [vmem:[%s3461_s14 + $0x728] sm:$0xff] }
 0x134   : > { %935 = vmatprep.mubr.f32.mxu0 %v423_v23  ;;  %v660_v23 = vld [vmem:[%s3461_s14 + $0x740] sm:$0xff] }
 0x135   : > { %v2299_v29 = vpack.c.bf16 %v660_v23, %v657_v22  ;;  %v689_v22 = vld [vmem:[%s3461_s14 + $0x828] sm:$0xff]  ;;  %v688_v23 = vld [vmem:[%s3461_s14 + $0x820] sm:$0xff] }
 0x136   : > { %1540 = vmatmul.mubr.f32.gmra.mrb[46].mxu1 %v422_v24 }
 0x137   : > { %936 = vmatmul.mubr.f32.gmra.mrb[46].mxu0 %v422_v24  ;;  %1609 = vmatprep.mubr.f32.mxu1 %v287_v25  ;;  %v316_v24 = vld [vmem:[%s3451_s21 + $0x100] sm:$0xff] }
 0x138   : > { %1006 = vmatprep.mubr.f32.mxu0 %v287_v25  ;;  %v323_v25 = vld [vmem:[%s3451_s21 + $0x138] sm:$0xff] }
 0x13a   : > { %1610 = vmatmul.mubr.f32.vlgmr.msra.gmra.mrb[0].mxu1 %v286_v32 }
 0x13b   : > { %1007 = vmatmul.mubr.f32.vlgmr.msra.gmra.mrb[0].mxu0 %v286_v32  ;;  %1614 = vmatprep.mubr.f32.mxu1 %v293_v34  ;;  %v661_v32 = vld [vmem:[%s3461_s14 + $0x748] sm:$0xff] }
 0x13c   : > { %2278 = vmatpush1.bf16.msra.mxu0 %v2277_v33  ;;  %2437 = vmatpush1.bf16.msra.mxu1 %v2436_v35  ;;  %v663_v33 = vld [vmem:[%s3461_s14 + $0x758] sm:$0xff]  ;;  %v322_v35 = vld [vmem:[%s3451_s21 + $0x130] sm:$0xff]  ;;  %v2454_v38 = vpack.c.bf16 %v661_v32, %v658_v31  ;;  %v692_v31 = vld [vmem:[%s3461_s14 + $0x840] sm:$0xff] }
 0x13d   : > { %1012 = vmatprep.mubr.f32.mxu0 %v293_v34  ;;  %2280 = vmatprep.subr.bf16.mxu0 %v2279_v37  ;;  %v666_v34 = vld [vmem:[%s3461_s14 + $0x770] sm:$0xff]  ;;  %v2301_v37 = vpack.c.bf16 %v659_v30, %v656_v28  ;;  %v359_v28 = vld [vmem:[%s3451_s21 + $0x258] sm:$0xff] }
 0x13e   : > { %2438 = vmatprep.subr.bf16.mxu1 %v3151_v0  ;;  %1615 = vmatmul.mubr.f32.gmra.mrb[2].mxu1 %v292_v43  ;;  %v2303_v40 = vpack.c.bf16 %v666_v34, %v663_v33  ;;  %v695_v33 = vld [vmem:[%s3461_s14 + $0x858] sm:$0xff]  ;;  %v694_v34 = vld [vmem:[%s3461_s14 + $0x850] sm:$0xff] }
 0x13f   : > { %1013 = vmatmul.mubr.f32.gmra.mrb[2].mxu0 %v292_v43  ;;  %1619 = vmatprep.mubr.f32.mxu1 %v299_v44  ;;  %v667_v43 = vld [vmem:[%s3461_s14 + $0x778] sm:$0xff] }
 0x140   : > { %1018 = vmatprep.mubr.f32.mxu0 %v299_v44  ;;  %2282 = vmatpush1.bf16.msra.mxu0 %v2281_v45  ;;  %v669_v44 = vld [vmem:[%s3461_s14 + $0x788] sm:$0xff]  ;;  %v672_v45 = vld [vmem:[%s3461_s14 + $0x7a0] sm:$0xff]  ;;  %v2457_v49 = vpack.c.bf16 %v667_v43, %v664_v42  ;;  %v698_v42 = vld [vmem:[%s3461_s14 + $0x870] sm:$0xff] }
 0x141   : > { %2440 = vmatpush1.bf16.msra.mxu1 %v2439_v46  ;;  %2284 = vmatprep.subr.bf16.mxu0 %v2283_v48  ;;  %v328_v46 = vld [vmem:[%s3451_s21 + $0x160] sm:$0xff]  ;;  %v2305_v48 = vpack.c.bf16 %v665_v41, %v662_v39  ;;  %v2307_v51 = vpack.c.bf16 %v672_v45, %v669_v44  ;;  %v365_v39 = vld [vmem:[%s3451_s21 + $0x288] sm:$0xff] }
 0x142   : > { %2441 = vmatprep.subr.bf16.mxu1 %v3151_v0  ;;  %1620 = vmatmul.mubr.f32.gmra.mrb[4].mxu1 %v298_v54  ;;  %v701_v44 = vld [vmem:[%s3461_s14 + $0x888] sm:$0xff]  ;;  %v700_v45 = vld [vmem:[%s3461_s14 + $0x880] sm:$0xff] }
 0x143   : > { %1019 = vmatmul.mubr.f32.gmra.mrb[4].mxu0 %v298_v54  ;;  %1624 = vmatprep.mubr.f32.mxu1 %v305_v55  ;;  %v673_v54 = vld [vmem:[%s3461_s14 + $0x7a8] sm:$0xff] }
 0x144   : > { %1024 = vmatprep.mubr.f32.mxu0 %v305_v55  ;;  %2286 = vmatpush1.bf16.msra.mxu0 %v2285_v56  ;;  %v675_v55 = vld [vmem:[%s3461_s14 + $0x7b8] sm:$0xff]  ;;  %v678_v56 = vld [vmem:[%s3461_s14 + $0x7d0] sm:$0xff]  ;;  %v2460_v60 = vpack.c.bf16 %v673_v54, %v670_v53  ;;  %v704_v53 = vld [vmem:[%s3461_s14 + $0x8a0] sm:$0xff] }
 0x145   : > { %2443 = vmatpush1.bf16.msra.mxu1 %v2442_v57  ;;  %2288 = vmatprep.subr.bf16.mxu0 %v2287_v59  ;;  %v334_v57 = vld [vmem:[%s3451_s21 + $0x190] sm:$0xff]  ;;  %v2309_v59 = vpack.c.bf16 %v671_v52, %v668_v50  ;;  %v2311_v62 = vpack.c.bf16 %v678_v56, %v675_v55  ;;  %v371_v50 = vld [vmem:[%s3451_s21 + $0x2b8] sm:$0xff] }
 0x146   : > { %2444 = vmatprep.subr.bf16.mxu1 %v3151_v0  ;;  %1625 = vmatmul.mubr.f32.gmra.mrb[6].mxu1 %v304_v2  ;;  %v707_v55 = vld [vmem:[%s3461_s14 + $0x8b8] sm:$0xff]  ;;  %v706_v56 = vld [vmem:[%s3461_s14 + $0x8b0] sm:$0xff] }
 0x147   : > { %1025 = vmatmul.mubr.f32.gmra.mrb[6].mxu0 %v304_v2  ;;  %1629 = vmatprep.mubr.f32.mxu1 %v311_v3  ;;  %v679_v2 = vld [vmem:[%s3461_s14 + $0x7d8] sm:$0xff] }
 0x148   : > { %1030 = vmatprep.mubr.f32.mxu0 %v311_v3  ;;  %2290 = vmatpush1.bf16.msra.mxu0 %v2289_v4  ;;  %v681_v3 = vld [vmem:[%s3461_s14 + $0x7e8] sm:$0xff]  ;;  %v684_v4 = vld [vmem:[%s3461_s14 + $0x800] sm:$0xff]  ;;  %v2463_v8 = vpack.c.bf16 %v679_v2, %v676_v1  ;;  %v710_v1 = vld [vmem:[%s3461_s14 + $0x8d0] sm:$0xff] }
 0x149   : > { %2446 = vmatpush1.bf16.msra.mxu1 %v2445_v5  ;;  %2292 = vmatprep.subr.bf16.mxu0 %v2291_v7  ;;  %v340_v5 = vld [vmem:[%s3451_s21 + $0x1c0] sm:$0xff]  ;;  %v2313_v7 = vpack.c.bf16 %v677_v63, %v674_v61  ;;  %v2315_v10 = vpack.c.bf16 %v684_v4, %v681_v3  ;;  %v377_v61 = vld [vmem:[%s3451_s21 + $0x2e8] sm:$0xff] }
 0x14a   : > { %2447 = vmatprep.subr.bf16.mxu1 %v3151_v0  ;;  %1630 = vmatmul.mubr.f32.gmra.mrb[8].mxu1 %v310_v13  ;;  %v713_v3 = vld [vmem:[%s3461_s14 + $0x8e8] sm:$0xff]  ;;  %v712_v4 = vld [vmem:[%s3461_s14 + $0x8e0] sm:$0xff] }
 0x14b   : > { %1031 = vmatmul.mubr.f32.gmra.mrb[8].mxu0 %v310_v13  ;;  %1634 = vmatprep.mubr.f32.mxu1 %v317_v14  ;;  %v685_v13 = vld [vmem:[%s3461_s14 + $0x808] sm:$0xff] }
 0x14c   : > { %1036 = vmatprep.mubr.f32.mxu0 %v317_v14  ;;  %2294 = vmatpush1.bf16.msra.mxu0 %v2293_v15  ;;  %v687_v14 = vld [vmem:[%s3461_s14 + $0x818] sm:$0xff]  ;;  %v690_v15 = vld [vmem:[%s3461_s14 + $0x830] sm:$0xff]  ;;  %v2466_v19 = vpack.c.bf16 %v685_v13, %v682_v12  ;;  %v388_v12 = vld [vmem:[%s3451_s21 + $0x340] sm:$0xff] }
 0x14d   : > { %2449 = vmatpush1.bf16.msra.mxu1 %v2448_v16  ;;  %2296 = vmatprep.subr.bf16.mxu0 %v2295_v18  ;;  %v346_v16 = vld [vmem:[%s3451_s21 + $0x1f0] sm:$0xff]  ;;  %v2317_v18 = vpack.c.bf16 %v683_v11, %v680_v9  ;;  %v2319_v21 = vpack.c.bf16 %v690_v15, %v687_v14  ;;  %v389_v11 = vld [vmem:[%s3451_s21 + $0x348] sm:$0xff]  ;;  %v395_v13 = vld [vmem:[%s3451_s21 + $0x378] sm:$0xff] }
 0x14e   : > { %2450 = vmatprep.subr.bf16.mxu1 %v3151_v0  ;;  %1635 = vmatmul.mubr.f32.gmra.mrb[10].mxu1 %v316_v24  ;;  %v401_v14 = vld [vmem:[%s3451_s21 + $0x3a8] sm:$0xff]  ;;  %v400_v15 = vld [vmem:[%s3451_s21 + $0x3a0] sm:$0xff] }
 0x14f   : > { %1037 = vmatmul.mubr.f32.gmra.mrb[10].mxu0 %v316_v24  ;;  %1639 = vmatprep.mubr.f32.mxu1 %v323_v25  ;;  %v691_v24 = vld [vmem:[%s3461_s14 + $0x838] sm:$0xff] }
 0x150   : > { %1042 = vmatprep.mubr.f32.mxu0 %v323_v25  ;;  %2298 = vmatpush1.bf16.msra.mxu0 %v2297_v26  ;;  %v693_v25 = vld [vmem:[%s3461_s14 + $0x848] sm:$0xff]  ;;  %v696_v26 = vld [vmem:[%s3461_s14 + $0x860] sm:$0xff]  ;;  %v2469_v30 = vpack.c.bf16 %v691_v24, %v688_v23 }
 0x151   : > { %2452 = vmatpush1.bf16.msra.mxu1 %v2451_v27  ;;  %2300 = vmatprep.subr.bf16.mxu0 %v2299_v29  ;;  %v352_v27 = vld [vmem:[%s3451_s21 + $0x220] sm:$0xff]  ;;  %v2321_v29 = vpack.c.bf16 %v689_v22, %v686_v20  ;;  %v2323_v32 = vpack.c.bf16 %v696_v26, %v693_v25  ;;  %v419_v20 = vld [vmem:[%s3451_s21 + $0x438] sm:$0xff]  ;;  %v425_v22 = vld [vmem:[%s3451_s21 + $0x468] sm:$0xff] }
 0x152   : > { %2453 = vmatprep.subr.bf16.mxu1 %v3151_v0  ;;  %1640 = vmatmul.mubr.f32.gmra.mrb[12].mxu1 %v322_v35  ;;  %v424_v23 = vld [vmem:[%s3451_s21 + $0x460] sm:$0xff]  ;;  %v289_v24 = vld [vmem:[%s3451_s21 + $0x28] sm:$0xff]  ;;  %v295_v26 = vld [vmem:[%s3451_s21 + $0x58] sm:$0xff] }
 0x153   : > { %1043 = vmatmul.mubr.f32.gmra.mrb[12].mxu0 %v322_v35  ;;  %1644 = vmatprep.mubr.f32.mxu1 %v329_v36  ;;  %v697_v35 = vld [vmem:[%s3461_s14 + $0x868] sm:$0xff]  ;;  %v288_v25 = vld [vmem:[%s3451_s21 + $0x20] sm:$0xff] }
 0x154   : > { %1048 = vmatprep.mubr.f32.mxu0 %v329_v36  ;;  %2302 = vmatpush1.bf16.msra.mxu0 %v2301_v37  ;;  %v699_v36 = vld [vmem:[%s3461_s14 + $0x878] sm:$0xff]  ;;  %v702_v37 = vld [vmem:[%s3461_s14 + $0x890] sm:$0xff]  ;;  %v2472_v41 = vpack.c.bf16 %v697_v35, %v694_v34 }
 0x155   : > { %2455 = vmatpush1.bf16.msra.mxu1 %v2454_v38  ;;  %2304 = vmatprep.subr.bf16.mxu0 %v2303_v40  ;;  %v358_v38 = vld [vmem:[%s3451_s21 + $0x250] sm:$0xff]  ;;  %v2325_v40 = vpack.c.bf16 %v695_v33, %v692_v31  ;;  %v2327_v43 = vpack.c.bf16 %v702_v37, %v699_v36  ;;  %v312_v33 = vld [vmem:[%s3451_s21 + $0xe0] sm:$0xff]  ;;  %v319_v34 = vld [vmem:[%s3451_s21 + $0x118] sm:$0xff] }
 0x156   : > { %2456 = vmatprep.subr.bf16.mxu1 %v3151_v0  ;;  %1645 = vmatmul.mubr.f32.gmra.mrb[14].mxu1 %v328_v46  ;;  %v306_v31 = vld [vmem:[%s3451_s21 + $0xb0] sm:$0xff]  ;;  %v325_v36 = vld [vmem:[%s3451_s21 + $0x148] sm:$0xff]  ;;  %v324_v37 = vld [vmem:[%s3451_s21 + $0x140] sm:$0xff] }
 0x157   : > { %1049 = vmatmul.mubr.f32.gmra.mrb[14].mxu0 %v328_v46  ;;  %1649 = vmatprep.mubr.f32.mxu1 %v335_v47  ;;  %v703_v46 = vld [vmem:[%s3461_s14 + $0x898] sm:$0xff]  ;;  %v318_v35 = vld [vmem:[%s3451_s21 + $0x110] sm:$0xff] }
 0x158   : > { %1054 = vmatprep.mubr.f32.mxu0 %v335_v47  ;;  %2306 = vmatpush1.bf16.msra.mxu0 %v2305_v48  ;;  %v705_v47 = vld [vmem:[%s3461_s14 + $0x8a8] sm:$0xff]  ;;  %v708_v48 = vld [vmem:[%s3461_s14 + $0x8c0] sm:$0xff]  ;;  %v2475_v52 = vpack.c.bf16 %v703_v46, %v700_v45  ;;  %v355_v46 = vld [vmem:[%s3451_s21 + $0x238] sm:$0xff] }
 0x159   : > { %2458 = vmatpush1.bf16.msra.mxu1 %v2457_v49  ;;  %2308 = vmatprep.subr.bf16.mxu0 %v2307_v51  ;;  %v364_v49 = vld [vmem:[%s3451_s21 + $0x280] sm:$0xff]  ;;  %v2329_v51 = vpack.c.bf16 %v701_v44, %v698_v42  ;;  %v2331_v54 = vpack.c.bf16 %v708_v48, %v705_v47  ;;  %v343_v42 = vld [vmem:[%s3451_s21 + $0x1d8] sm:$0xff]  ;;  %v349_v44 = vld [vmem:[%s3451_s21 + $0x208] sm:$0xff] }
 0x15a   : > { %2459 = vmatprep.subr.bf16.mxu1 %v3151_v0  ;;  %1650 = vmatmul.mubr.f32.gmra.mrb[16].mxu1 %v334_v57  ;;  %v348_v45 = vld [vmem:[%s3451_s21 + $0x200] sm:$0xff]  ;;  %v354_v47 = vld [vmem:[%s3451_s21 + $0x230] sm:$0xff]  ;;  %v361_v48 = vld [vmem:[%s3451_s21 + $0x268] sm:$0xff] }
 0x15b   : > { %1055 = vmatmul.mubr.f32.gmra.mrb[16].mxu0 %v334_v57  ;;  %1654 = vmatprep.mubr.f32.mxu1 %v341_v58  ;;  %v709_v57 = vld [vmem:[%s3461_s14 + $0x8c8] sm:$0xff] }
 0x15c   : > { %1060 = vmatprep.mubr.f32.mxu0 %v341_v58  ;;  %2310 = vmatpush1.bf16.msra.mxu0 %v2309_v59  ;;  %v711_v58 = vld [vmem:[%s3461_s14 + $0x8d8] sm:$0xff]  ;;  %v714_v59 = vld [vmem:[%s3461_s14 + $0x8f0] sm:$0xff]  ;;  %v2478_v63 = vpack.c.bf16 %v709_v57, %v706_v56  ;;  %v385_v56 = vld [vmem:[%s3451_s21 + $0x328] sm:$0xff] }
 0x15d   : > { %2461 = vmatpush1.bf16.msra.mxu1 %v2460_v60  ;;  %2312 = vmatprep.subr.bf16.mxu0 %v2311_v62  ;;  %v370_v60 = vld [vmem:[%s3451_s21 + $0x2b0] sm:$0xff]  ;;  %v2333_v62 = vpack.c.bf16 %v707_v55, %v704_v53  ;;  %v2335_v2 = vpack.c.bf16 %v714_v59, %v711_v58  ;;  %v372_v53 = vld [vmem:[%s3451_s21 + $0x2c0] sm:$0xff]  ;;  %v391_v58 = vld [vmem:[%s3451_s21 + $0x358] sm:$0xff] }
 0x15e   : > { %2462 = vmatprep.subr.bf16.mxu1 %v3151_v0  ;;  %1655 = vmatmul.mubr.f32.gmra.mrb[18].mxu1 %v340_v5  ;;  %v378_v55 = vld [vmem:[%s3451_s21 + $0x2f0] sm:$0xff]  ;;  %v384_v57 = vld [vmem:[%s3451_s21 + $0x320] sm:$0xff] }
 0x15f   : > { %1061 = vmatmul.mubr.f32.gmra.mrb[18].mxu0 %v340_v5  ;;  %1659 = vmatprep.mubr.f32.mxu1 %v347_v6  ;;  %v715_v5 = vld [vmem:[%s3461_s14 + $0x8f8] sm:$0xff]  ;;  %v390_v59 = vld [vmem:[%s3451_s21 + $0x350] sm:$0xff]  ;;  %s2998_s14 = scalar_lea.vmem %s2997_s11, 18432 }
 0x160   : > { %1066 = vmatprep.mubr.f32.mxu0 %v347_v6  ;;  %2314 = vmatpush1.bf16.msra.mxu0 %v2313_v7  ;;  %v376_v6 = vld [vmem:[%s3451_s21 + $0x2e0] sm:$0xff]  ;;  %v383_v7 = vld [vmem:[%s3451_s21 + $0x318] sm:$0xff]  ;;  %v2481_v9 = vpack.c.bf16 %v715_v5, %v712_v4  ;;  %v414_v4 = vld [vmem:[%s3451_s21 + $0x410] sm:$0xff]  ;;  %p3000_p9 = scmp.lt.s32.totalorder %s2998_s14, %s2992_s10 }
 0x161   : > { %2464 = vmatpush1.bf16.msra.mxu1 %v2463_v8  ;;  %2316 = vmatprep.subr.bf16.mxu0 %v2315_v10  ;;  %v2337_v8 = vpack.c.bf16 %v713_v3, %v710_v1  ;;  %v382_v10 = vld [vmem:[%s3451_s21 + $0x310] sm:$0xff]  ;;  %v409_v1 = vld [vmem:[%s3451_s21 + $0x3e8] sm:$0xff]  ;;  %v415_v3 = vld [vmem:[%s3451_s21 + $0x418] sm:$0xff] }
 0x162   : > { %2465 = vmatprep.subr.bf16.mxu1 %v3151_v0  ;;  %1660 = vmatmul.mubr.f32.gmra.mrb[20].mxu1 %v346_v16  ;;  %v421_v5 = vld [vmem:[%s3451_s21 + $0x448] sm:$0xff]  ;;  %p3001_p8 = por %p3000_p9, %p2999_p7 }
 0x163   : > { %1067 = vmatmul.mubr.f32.gmra.mrb[20].mxu0 %v346_v16  ;;  %1664 = vmatprep.mubr.f32.mxu1 %v353_v17  ;;  %v407_v16 = vld [vmem:[%s3451_s21 + $0x3d8] sm:$0xff] }
 0x164   : > { %1072 = vmatprep.mubr.f32.mxu0 %v353_v17  ;;  %2318 = vmatpush1.bf16.msra.mxu0 %v2317_v18  ;;  %v406_v17 = vld [vmem:[%s3451_s21 + $0x3d0] sm:$0xff]  ;;  %v413_v18 = vld [vmem:[%s3451_s21 + $0x408] sm:$0xff]  ;;  %p3002_p2 = pnand %p3001_p8, %p2995_p1 }
 0x165   : > { %2467 = vmatpush1.bf16.msra.mxu1 %v2466_v19  ;;  %2320 = vmatprep.subr.bf16.mxu0 %v2319_v21  ;;  %v412_v19 = vld [vmem:[%s3451_s21 + $0x400] sm:$0xff]  ;;  %v418_v21 = vld [vmem:[%s3451_s21 + $0x430] sm:$0xff] }
 0x166   : > { %2468 = vmatprep.subr.bf16.mxu1 %v3151_v0  ;;  %1665 = vmatmul.mubr.f32.gmra.mrb[22].mxu1 %v352_v27 }
 0x167   : > { %1073 = vmatmul.mubr.f32.gmra.mrb[22].mxu0 %v352_v27  ;;  %1669 = vmatprep.mubr.f32.mxu1 %v359_v28  ;;  %v294_v27 = vld [vmem:[%s3451_s21 + $0x50] sm:$0xff] }
 0x168   : > { %1078 = vmatprep.mubr.f32.mxu0 %v359_v28  ;;  %2322 = vmatpush1.bf16.msra.mxu0 %v2321_v29  ;;  %v301_v28 = vld [vmem:[%s3451_s21 + $0x88] sm:$0xff]  ;;  %v300_v29 = vld [vmem:[%s3451_s21 + $0x80] sm:$0xff] }
 0x169   : > { %2470 = vmatpush1.bf16.msra.mxu1 %v2469_v30  ;;  %2324 = vmatprep.subr.bf16.mxu0 %v2323_v32  ;;  %v307_v30 = vld [vmem:[%s3451_s21 + $0xb8] sm:$0xff]  ;;  %v313_v32 = vld [vmem:[%s3451_s21 + $0xe8] sm:$0xff] }
 0x16a   : > { %2471 = vmatprep.subr.bf16.mxu1 %v3151_v0  ;;  %1670 = vmatmul.mubr.f32.gmra.mrb[24].mxu1 %v358_v38 }
 0x16b   : > { %1079 = vmatmul.mubr.f32.gmra.mrb[24].mxu0 %v358_v38  ;;  %1674 = vmatprep.mubr.f32.mxu1 %v365_v39  ;;  %v331_v38 = vld [vmem:[%s3451_s21 + $0x178] sm:$0xff] }
 0x16c   : > { %1084 = vmatprep.mubr.f32.mxu0 %v365_v39  ;;  %2326 = vmatpush1.bf16.msra.mxu0 %v2325_v40  ;;  %v330_v39 = vld [vmem:[%s3451_s21 + $0x170] sm:$0xff]  ;;  %v337_v40 = vld [vmem:[%s3451_s21 + $0x1a8] sm:$0xff] }
 0x16d   : > { %2473 = vmatpush1.bf16.msra.mxu1 %v2472_v41  ;;  %2328 = vmatprep.subr.bf16.mxu0 %v2327_v43  ;;  %v336_v41 = vld [vmem:[%s3451_s21 + $0x1a0] sm:$0xff]  ;;  %v342_v43 = vld [vmem:[%s3451_s21 + $0x1d0] sm:$0xff] }
 0x16e   : > { %2474 = vmatprep.subr.bf16.mxu1 %v3151_v0  ;;  %1675 = vmatmul.mubr.f32.gmra.mrb[26].mxu1 %v364_v49 }
 0x16f   : > { %1085 = vmatmul.mubr.f32.gmra.mrb[26].mxu0 %v364_v49  ;;  %1679 = vmatprep.mubr.f32.mxu1 %v371_v50  ;;  %v360_v49 = vld [vmem:[%s3451_s21 + $0x260] sm:$0xff] }
 0x170   : > { %1090 = vmatprep.mubr.f32.mxu0 %v371_v50  ;;  %2330 = vmatpush1.bf16.msra.mxu0 %v2329_v51  ;;  %v367_v50 = vld [vmem:[%s3451_s21 + $0x298] sm:$0xff]  ;;  %v366_v51 = vld [vmem:[%s3451_s21 + $0x290] sm:$0xff] }
 0x171   : > { %2476 = vmatpush1.bf16.msra.mxu1 %v2475_v52  ;;  %2332 = vmatprep.subr.bf16.mxu0 %v2331_v54  ;;  %v373_v52 = vld [vmem:[%s3451_s21 + $0x2c8] sm:$0xff]  ;;  %v379_v54 = vld [vmem:[%s3451_s21 + $0x2f8] sm:$0xff] }
 0x172   : > { %2477 = vmatprep.subr.bf16.mxu1 %v3151_v0  ;;  %1680 = vmatmul.mubr.f32.gmra.mrb[28].mxu1 %v370_v60 }
 0x173   : > { %1091 = vmatmul.mubr.f32.gmra.mrb[28].mxu0 %v370_v60  ;;  %1684 = vmatprep.mubr.f32.mxu1 %v377_v61  ;;  %v397_v60 = vld [vmem:[%s3451_s21 + $0x388] sm:$0xff] }
 0x174   : > { %1096 = vmatprep.mubr.f32.mxu0 %v377_v61  ;;  %2334 = vmatpush1.bf16.msra.mxu0 %v2333_v62  ;;  %v396_v61 = vld [vmem:[%s3451_s21 + $0x380] sm:$0xff]  ;;  %v403_v62 = vld [vmem:[%s3451_s21 + $0x3b8] sm:$0xff] }
 0x175   : > { %2479 = vmatpush1.bf16.msra.mxu1 %v2478_v63  ;;  %2336 = vmatprep.subr.bf16.mxu0 %v2335_v2  ;;  %v402_v63 = vld [vmem:[%s3451_s21 + $0x3b0] sm:$0xff]  ;;  %v408_v2 = vld [vmem:[%s3451_s21 + $0x3e0] sm:$0xff] }
 0x176   : > { %2480 = vmatprep.subr.bf16.mxu1 %v3151_v0  ;;  %1685 = vmatmul.mubr.f32.gmra.mrb[30].mxu1 %v376_v6  ;;  %v394_v0 = vld [vmem:[%s3451_s21 + $0x370] sm:$0xff] }
 0x177   : > { %1097 = vmatmul.mubr.f32.gmra.mrb[30].mxu0 %v376_v6  ;;  %1689 = vmatprep.mubr.f32.mxu1 %v383_v7  ;;  %v420_v6 = vld [vmem:[%s3451_s21 + $0x440] sm:$0xff] }
 0x178   : > { %1102 = vmatprep.mubr.f32.mxu0 %v383_v7  ;;  %2338 = vmatpush1.bf16.msra.mxu0 %v2337_v8  ;;  %v427_v7 = vld [vmem:[%s3451_s21 + $0x478] sm:$0xff]  ;;  %v426_v8 = vld [vmem:[%s3451_s21 + $0x470] sm:$0xff]  ;;  %s4104_s21 = scalar_lea.hbm %s4244_s20, %s2142_s8 }
 0x179   : > { %2482 = vmatpush1.bf16.msra.mxu1 %v2481_v9  ;;  %v718_v9 = vlaneseq }
 0x17a   : > { %1690 = vmatmul.mubr.f32.gmra.mrb[32].mxu1 %v382_v10 }
 0x17b   : > { %1103 = vmatmul.mubr.f32.gmra.mrb[32].mxu0 %v382_v10  ;;  %1694 = vmatprep.mubr.f32.mxu1 %v389_v11  ;;  %v719_v10 = vshrl.u32 %v718_v9, 7 }
 0x17c   : > { %1108 = vmatprep.mubr.f32.mxu0 %v389_v11 }
 0x17d   : > { %v728_v11 = vsub.s32 2, %v719_v10 }
 0x17e   : > { %1695 = vmatmul.mubr.f32.gmra.mrb[34].mxu1 %v388_v12 }
 0x17f   : > { %1109 = vmatmul.mubr.f32.gmra.mrb[34].mxu0 %v388_v12  ;;  %1699 = vmatprep.mubr.f32.mxu1 %v395_v13  ;;  %v720_v12 = vsub.s32 0, %v719_v10 }
 0x180   : > { %1114 = vmatprep.mubr.f32.mxu0 %v395_v13  ;;  %v716_v13 = vld [vmem:[%s246_s6] sm:$0x7] }
 0x182   : > { %1700 = vmatmul.mubr.f32.gmra.mrb[36].mxu1 %v394_v0 }
 0x183   : > { %1115 = vmatmul.mubr.f32.gmra.mrb[36].mxu0 %v394_v0  ;;  %1704 = vmatprep.mubr.f32.mxu1 %v401_v14  ;;  %v724_v0 = vsub.s32 1, %v719_v10 }
 0x184   : > { %1120 = vmatprep.mubr.f32.mxu0 %v401_v14  ;;  %v3952_v14 = vrot.slane %v716_v13, %v728_v11 }
 0x186   : > { %1705 = vmatmul.mubr.f32.gmra.mrb[38].mxu1 %v400_v15 }
 0x187   : > { %1121 = vmatmul.mubr.f32.gmra.mrb[38].mxu0 %v400_v15  ;;  %1709 = vmatprep.mubr.f32.mxu1 %v407_v16  ;;  %v3954_v15 = vrot.slane %v716_v13, %v720_v12 }
 0x188   : > { %1126 = vmatprep.mubr.f32.mxu0 %v407_v16  ;;  %v3956_v16 = vrot.slane %v716_v13, %v724_v0 }
 0x18a   : > { %1710 = vmatmul.mubr.f32.gmra.mrb[40].mxu1 %v406_v17 }
 0x18b   : > { %1127 = vmatmul.mubr.f32.gmra.mrb[40].mxu0 %v406_v17  ;;  %1714 = vmatprep.mubr.f32.mxu1 %v413_v18 }
 0x18c   : > { %1132 = vmatprep.mubr.f32.mxu0 %v413_v18 }
 0x18e   : > { %1715 = vmatmul.mubr.f32.gmra.mrb[42].mxu1 %v412_v19 }
 0x18f   : > { %1133 = vmatmul.mubr.f32.gmra.mrb[42].mxu0 %v412_v19  ;;  %1719 = vmatprep.mubr.f32.mxu1 %v419_v20 }
 0x190   : > { %1138 = vmatprep.mubr.f32.mxu0 %v419_v20 }
 0x192   : > { %1720 = vmatmul.mubr.f32.gmra.mrb[44].mxu1 %v418_v21 }
 0x193   : > { %1139 = vmatmul.mubr.f32.gmra.mrb[44].mxu0 %v418_v21  ;;  %1724 = vmatprep.mubr.f32.mxu1 %v425_v22 }
 0x194   : > { %1144 = vmatprep.mubr.f32.mxu0 %v425_v22 }
 0x196   : > { %1725 = vmatmul.mubr.f32.gmra.mrb[46].mxu1 %v424_v23 }
 0x197   : > { %1145 = vmatmul.mubr.f32.gmra.mrb[46].mxu0 %v424_v23  ;;  %1794 = vmatprep.mubr.f32.mxu1 %v289_v24 }
 0x198   : > { %1215 = vmatprep.mubr.f32.mxu0 %v289_v24 }
 0x19a   : > { %1795 = vmatmul.mubr.f32.vlgmr.msra.gmra.mrb[0].mxu1 %v288_v25 }
 0x19b   : > { %1216 = vmatmul.mubr.f32.vlgmr.msra.gmra.mrb[0].mxu0 %v288_v25  ;;  %1799 = vmatprep.mubr.f32.mxu1 %v295_v26 }
 0x19c   : > { %1221 = vmatprep.mubr.f32.mxu0 %v295_v26 }
 0x19e   : > { %1800 = vmatmul.mubr.f32.gmra.mrb[2].mxu1 %v294_v27 }
 0x19f   : > { %1222 = vmatmul.mubr.f32.gmra.mrb[2].mxu0 %v294_v27  ;;  %1804 = vmatprep.mubr.f32.mxu1 %v301_v28 }
 0x1a0   : > { %1227 = vmatprep.mubr.f32.mxu0 %v301_v28 }
 0x1a2   : > { %1805 = vmatmul.mubr.f32.gmra.mrb[4].mxu1 %v300_v29 }
 0x1a3   : > { %1228 = vmatmul.mubr.f32.gmra.mrb[4].mxu0 %v300_v29  ;;  %1809 = vmatprep.mubr.f32.mxu1 %v307_v30 }
 0x1a4   : > { %1233 = vmatprep.mubr.f32.mxu0 %v307_v30 }
 0x1a6   : > { %1810 = vmatmul.mubr.f32.gmra.mrb[6].mxu1 %v306_v31 }
 0x1a7   : > { %1234 = vmatmul.mubr.f32.gmra.mrb[6].mxu0 %v306_v31  ;;  %1814 = vmatprep.mubr.f32.mxu1 %v313_v32 }
 0x1a8   : > { %1239 = vmatprep.mubr.f32.mxu0 %v313_v32 }
 0x1aa   : > { %1815 = vmatmul.mubr.f32.gmra.mrb[8].mxu1 %v312_v33 }
 0x1ab   : > { %1240 = vmatmul.mubr.f32.gmra.mrb[8].mxu0 %v312_v33  ;;  %1819 = vmatprep.mubr.f32.mxu1 %v319_v34 }
 0x1ac   : > { %1245 = vmatprep.mubr.f32.mxu0 %v319_v34 }
 0x1ae   : > { %1820 = vmatmul.mubr.f32.gmra.mrb[10].mxu1 %v318_v35 }
 0x1af   : > { %1246 = vmatmul.mubr.f32.gmra.mrb[10].mxu0 %v318_v35  ;;  %1824 = vmatprep.mubr.f32.mxu1 %v325_v36 }
 0x1b0   : > { %1251 = vmatprep.mubr.f32.mxu0 %v325_v36 }
 0x1b2   : > { %1825 = vmatmul.mubr.f32.gmra.mrb[12].mxu1 %v324_v37 }
 0x1b3   : > { %1252 = vmatmul.mubr.f32.gmra.mrb[12].mxu0 %v324_v37  ;;  %1829 = vmatprep.mubr.f32.mxu1 %v331_v38 }
 0x1b4   : > { %1257 = vmatprep.mubr.f32.mxu0 %v331_v38 }
 0x1b6   : > { %1830 = vmatmul.mubr.f32.gmra.mrb[14].mxu1 %v330_v39 }
 0x1b7   : > { %1258 = vmatmul.mubr.f32.gmra.mrb[14].mxu0 %v330_v39  ;;  %1834 = vmatprep.mubr.f32.mxu1 %v337_v40 }
 0x1b8   : > { %1263 = vmatprep.mubr.f32.mxu0 %v337_v40 }
 0x1ba   : > { %1835 = vmatmul.mubr.f32.gmra.mrb[16].mxu1 %v336_v41 }
 0x1bb   : > { %1264 = vmatmul.mubr.f32.gmra.mrb[16].mxu0 %v336_v41  ;;  %1839 = vmatprep.mubr.f32.mxu1 %v343_v42 }
 0x1bc   : > { %1269 = vmatprep.mubr.f32.mxu0 %v343_v42 }
 0x1be   : > { %1840 = vmatmul.mubr.f32.gmra.mrb[18].mxu1 %v342_v43 }
 0x1bf   : > { %1270 = vmatmul.mubr.f32.gmra.mrb[18].mxu0 %v342_v43  ;;  %1844 = vmatprep.mubr.f32.mxu1 %v349_v44 }
 0x1c0   : > { %1275 = vmatprep.mubr.f32.mxu0 %v349_v44 }
 0x1c2   : > { %1845 = vmatmul.mubr.f32.gmra.mrb[20].mxu1 %v348_v45 }
 0x1c3   : > { %1276 = vmatmul.mubr.f32.gmra.mrb[20].mxu0 %v348_v45  ;;  %1849 = vmatprep.mubr.f32.mxu1 %v355_v46 }
 0x1c4   : > { %1281 = vmatprep.mubr.f32.mxu0 %v355_v46 }
 0x1c6   : > { %1850 = vmatmul.mubr.f32.gmra.mrb[22].mxu1 %v354_v47 }
 0x1c7   : > { %1282 = vmatmul.mubr.f32.gmra.mrb[22].mxu0 %v354_v47  ;;  %1854 = vmatprep.mubr.f32.mxu1 %v361_v48 }
 0x1c8   : > { %1287 = vmatprep.mubr.f32.mxu0 %v361_v48 }
 0x1ca   : > { %1855 = vmatmul.mubr.f32.gmra.mrb[24].mxu1 %v360_v49 }
 0x1cb   : > { %1288 = vmatmul.mubr.f32.gmra.mrb[24].mxu0 %v360_v49  ;;  %1859 = vmatprep.mubr.f32.mxu1 %v367_v50 }
 0x1cc   : > { %1293 = vmatprep.mubr.f32.mxu0 %v367_v50 }
 0x1ce   : > { %1860 = vmatmul.mubr.f32.gmra.mrb[26].mxu1 %v366_v51 }
 0x1cf   : > { %1294 = vmatmul.mubr.f32.gmra.mrb[26].mxu0 %v366_v51  ;;  %1864 = vmatprep.mubr.f32.mxu1 %v373_v52 }
 0x1d0   : > { %1299 = vmatprep.mubr.f32.mxu0 %v373_v52 }
 0x1d2   : > { %1865 = vmatmul.mubr.f32.gmra.mrb[28].mxu1 %v372_v53 }
 0x1d3   : > { %1300 = vmatmul.mubr.f32.gmra.mrb[28].mxu0 %v372_v53  ;;  %1869 = vmatprep.mubr.f32.mxu1 %v379_v54 }
 0x1d4   : > { %1305 = vmatprep.mubr.f32.mxu0 %v379_v54 }
 0x1d6   : > { %1870 = vmatmul.mubr.f32.gmra.mrb[30].mxu1 %v378_v55 }
 0x1d7   : > { %1306 = vmatmul.mubr.f32.gmra.mrb[30].mxu0 %v378_v55  ;;  %1874 = vmatprep.mubr.f32.mxu1 %v385_v56 }
 0x1d8   : > { %1311 = vmatprep.mubr.f32.mxu0 %v385_v56 }
 0x1da   : > { %1875 = vmatmul.mubr.f32.gmra.mrb[32].mxu1 %v384_v57 }
 0x1db   : > { %1312 = vmatmul.mubr.f32.gmra.mrb[32].mxu0 %v384_v57  ;;  %1879 = vmatprep.mubr.f32.mxu1 %v391_v58 }
 0x1dc   : > { %1317 = vmatprep.mubr.f32.mxu0 %v391_v58 }
 0x1de   : > { %1880 = vmatmul.mubr.f32.gmra.mrb[34].mxu1 %v390_v59 }
 0x1df   : > { %1318 = vmatmul.mubr.f32.gmra.mrb[34].mxu0 %v390_v59  ;;  %1884 = vmatprep.mubr.f32.mxu1 %v397_v60 }
 0x1e0   : > { %1323 = vmatprep.mubr.f32.mxu0 %v397_v60 }
 0x1e2   : > { %1885 = vmatmul.mubr.f32.gmra.mrb[36].mxu1 %v396_v61 }
 0x1e3   : > { %1324 = vmatmul.mubr.f32.gmra.mrb[36].mxu0 %v396_v61  ;;  %1889 = vmatprep.mubr.f32.mxu1 %v403_v62 }
 0x1e4   : > { %1329 = vmatprep.mubr.f32.mxu0 %v403_v62 }
 0x1e6   : > { %1890 = vmatmul.mubr.f32.gmra.mrb[38].mxu1 %v402_v63 }
 0x1e7   : > { %1330 = vmatmul.mubr.f32.gmra.mrb[38].mxu0 %v402_v63  ;;  %1894 = vmatprep.mubr.f32.mxu1 %v409_v1 }
 0x1e8   : > { %1335 = vmatprep.mubr.f32.mxu0 %v409_v1 }
 0x1ea   : > { %1895 = vmatmul.mubr.f32.gmra.mrb[40].mxu1 %v408_v2 }
 0x1eb   : > { %1336 = vmatmul.mubr.f32.gmra.mrb[40].mxu0 %v408_v2  ;;  %1899 = vmatprep.mubr.f32.mxu1 %v415_v3 }
 0x1ec   : > { %1341 = vmatprep.mubr.f32.mxu0 %v415_v3 }
 0x1ee   : > { %1900 = vmatmul.mubr.f32.gmra.mrb[42].mxu1 %v414_v4 }
 0x1ef   : > { %1342 = vmatmul.mubr.f32.gmra.mrb[42].mxu0 %v414_v4  ;;  %1904 = vmatprep.mubr.f32.mxu1 %v421_v5 }
 0x1f0   : > { %1347 = vmatprep.mubr.f32.mxu0 %v421_v5 }
 0x1f2   : > { %1905 = vmatmul.mubr.f32.gmra.mrb[44].mxu1 %v420_v6 }
 0x1f3   : > { %1348 = vmatmul.mubr.f32.gmra.mrb[44].mxu0 %v420_v6  ;;  %1909 = vmatprep.mubr.f32.mxu1 %v427_v7 }
 0x1f4   : > { %1353 = vmatprep.mubr.f32.mxu0 %v427_v7 }
 0x1f6   : > { %1910 = vmatmul.mubr.f32.gmra.mrb[46].mxu1 %v426_v8 }
 0x1f7   : > { %1354 = vmatmul.mubr.f32.gmra.mrb[46].mxu0 %v426_v8 }
 0x26d   : > { %v1796_v17 = vpop.f32.mrb[0].mxu1 }
 0x26e   : > { %v1217_v18 = vpop.f32.mrb[0].mxu0  ;;  %v2531_v19 = vadd.f32 %v1796_v17, %v3952_v14  ;;  %v1798_v21 = vpop.f32.mrb[1].mxu1 }
 0x26f   : > { %v2483_v20 = vadd.f32 %v1217_v18, %v3954_v15  ;;  %v1219_v22 = vpop.f32.mrb[1].mxu0 }
 0x270   : > { %v2484_v23 = vadd.f32 %v1219_v22, %v3956_v16  ;;  %1917 = vst [vmem:[%s3961_s9 + $0x10] sm:$0xff] %v2531_v19 }
 0x271   : > { %1915 = vst [vmem:[%s3961_s9] sm:$0xff] %v2483_v20  ;;  %v1801_v24 = vpop.f32.mrb[2].mxu1 }
 0x272   : > { %1916 = vst [vmem:[%s3961_s9 + $0x8] sm:$0xff] %v2484_v23  ;;  %v1223_v25 = vpop.f32.mrb[2].mxu0  ;;  %v2532_v26 = vadd.f32 %v1801_v24, %v3952_v14  ;;  %v1803_v28 = vpop.f32.mrb[3].mxu1 }
 0x273   : > { %v2485_v27 = vadd.f32 %v1223_v25, %v3954_v15  ;;  %v1225_v29 = vpop.f32.mrb[3].mxu0 }
 0x274   : > { %v2486_v30 = vadd.f32 %v1225_v29, %v3956_v16  ;;  %1920 = vst [vmem:[%s3961_s9 + $0x28] sm:$0xff] %v2532_v26 }
 0x275   : > { %1918 = vst [vmem:[%s3961_s9 + $0x18] sm:$0xff] %v2485_v27  ;;  %v1806_v31 = vpop.f32.mrb[4].mxu1 }
 0x276   : > { %1919 = vst [vmem:[%s3961_s9 + $0x20] sm:$0xff] %v2486_v30  ;;  %v1229_v32 = vpop.f32.mrb[4].mxu0  ;;  %v2533_v33 = vadd.f32 %v1806_v31, %v3952_v14  ;;  %v1808_v35 = vpop.f32.mrb[5].mxu1 }
 0x277   : > { %v2487_v34 = vadd.f32 %v1229_v32, %v3954_v15  ;;  %v1231_v36 = vpop.f32.mrb[5].mxu0 }
 0x278   : > { %v2488_v37 = vadd.f32 %v1231_v36, %v3956_v16  ;;  %1923 = vst [vmem:[%s3961_s9 + $0x40] sm:$0xff] %v2533_v33 }
 0x279   : > { %1921 = vst [vmem:[%s3961_s9 + $0x30] sm:$0xff] %v2487_v34  ;;  %v1811_v38 = vpop.f32.mrb[6].mxu1 }
 0x27a   : > { %1922 = vst [vmem:[%s3961_s9 + $0x38] sm:$0xff] %v2488_v37  ;;  %v1235_v39 = vpop.f32.mrb[6].mxu0  ;;  %v2534_v40 = vadd.f32 %v1811_v38, %v3952_v14  ;;  %v1813_v42 = vpop.f32.mrb[7].mxu1 }
 0x27b   : > { %v2489_v41 = vadd.f32 %v1235_v39, %v3954_v15  ;;  %v1237_v43 = vpop.f32.mrb[7].mxu0 }
 0x27c   : > { %v2490_v44 = vadd.f32 %v1237_v43, %v3956_v16  ;;  %1926 = vst [vmem:[%s3961_s9 + $0x58] sm:$0xff] %v2534_v40 }
 0x27d   : > { %1924 = vst [vmem:[%s3961_s9 + $0x48] sm:$0xff] %v2489_v41  ;;  %v1816_v45 = vpop.f32.mrb[8].mxu1 }
 0x27e   : > { %1925 = vst [vmem:[%s3961_s9 + $0x50] sm:$0xff] %v2490_v44  ;;  %v1241_v46 = vpop.f32.mrb[8].mxu0  ;;  %v2535_v47 = vadd.f32 %v1816_v45, %v3952_v14  ;;  %v1818_v49 = vpop.f32.mrb[9].mxu1 }
 0x27f   : > { %v2491_v48 = vadd.f32 %v1241_v46, %v3954_v15  ;;  %v1243_v50 = vpop.f32.mrb[9].mxu0 }
 0x280   : > { %v2492_v51 = vadd.f32 %v1243_v50, %v3956_v16  ;;  %1929 = vst [vmem:[%s3961_s9 + $0x70] sm:$0xff] %v2535_v47 }
 0x281   : > { %1927 = vst [vmem:[%s3961_s9 + $0x60] sm:$0xff] %v2491_v48  ;;  %v1821_v52 = vpop.f32.mrb[10].mxu1 }
 0x282   : > { %1928 = vst [vmem:[%s3961_s9 + $0x68] sm:$0xff] %v2492_v51  ;;  %v1247_v53 = vpop.f32.mrb[10].mxu0  ;;  %v2536_v54 = vadd.f32 %v1821_v52, %v3952_v14  ;;  %v1823_v56 = vpop.f32.mrb[11].mxu1 }
 0x283   : > { %v2493_v55 = vadd.f32 %v1247_v53, %v3954_v15  ;;  %v1249_v57 = vpop.f32.mrb[11].mxu0 }
 0x284   : > { %v2494_v58 = vadd.f32 %v1249_v57, %v3956_v16  ;;  %1932 = vst [vmem:[%s3961_s9 + $0x88] sm:$0xff] %v2536_v54 }
 0x285   : > { %1930 = vst [vmem:[%s3961_s9 + $0x78] sm:$0xff] %v2493_v55  ;;  %v1826_v59 = vpop.f32.mrb[12].mxu1 }
 0x286   : > { %1931 = vst [vmem:[%s3961_s9 + $0x80] sm:$0xff] %v2494_v58  ;;  %v1253_v60 = vpop.f32.mrb[12].mxu0  ;;  %v2537_v61 = vadd.f32 %v1826_v59, %v3952_v14  ;;  %v1828_v63 = vpop.f32.mrb[13].mxu1 }
 0x287   : > { %v2495_v62 = vadd.f32 %v1253_v60, %v3954_v15  ;;  %v1255_v1 = vpop.f32.mrb[13].mxu0 }
 0x288   : > { %v2496_v2 = vadd.f32 %v1255_v1, %v3956_v16  ;;  %1935 = vst [vmem:[%s3961_s9 + $0xa0] sm:$0xff] %v2537_v61 }
 0x289   : > { %1933 = vst [vmem:[%s3961_s9 + $0x90] sm:$0xff] %v2495_v62  ;;  %v1831_v3 = vpop.f32.mrb[14].mxu1 }
 0x28a   : > { %1934 = vst [vmem:[%s3961_s9 + $0x98] sm:$0xff] %v2496_v2  ;;  %v1259_v4 = vpop.f32.mrb[14].mxu0  ;;  %v2538_v5 = vadd.f32 %v1831_v3, %v3952_v14  ;;  %v1833_v7 = vpop.f32.mrb[15].mxu1 }
 0x28b   : > { %v2497_v6 = vadd.f32 %v1259_v4, %v3954_v15  ;;  %v1261_v8 = vpop.f32.mrb[15].mxu0 }
 0x28c   : > { %v2498_v9 = vadd.f32 %v1261_v8, %v3956_v16  ;;  %1938 = vst [vmem:[%s3961_s9 + $0xb8] sm:$0xff] %v2538_v5 }
 0x28d   : > { %1936 = vst [vmem:[%s3961_s9 + $0xa8] sm:$0xff] %v2497_v6  ;;  %v1836_v10 = vpop.f32.mrb[16].mxu1 }
 0x28e   : > { %1937 = vst [vmem:[%s3961_s9 + $0xb0] sm:$0xff] %v2498_v9  ;;  %v1265_v11 = vpop.f32.mrb[16].mxu0  ;;  %v2539_v12 = vadd.f32 %v1836_v10, %v3952_v14  ;;  %v1838_v0 = vpop.f32.mrb[17].mxu1 }
 0x28f   : > { %v2499_v13 = vadd.f32 %v1265_v11, %v3954_v15  ;;  %v1267_v17 = vpop.f32.mrb[17].mxu0 }
 0x290   : > { %v2500_v18 = vadd.f32 %v1267_v17, %v3956_v16  ;;  %1941 = vst [vmem:[%s3961_s9 + $0xd0] sm:$0xff] %v2539_v12 }
 0x291   : > { %1939 = vst [vmem:[%s3961_s9 + $0xc0] sm:$0xff] %v2499_v13  ;;  %v1841_v19 = vpop.f32.mrb[18].mxu1 }
 0x292   : > { %1940 = vst [vmem:[%s3961_s9 + $0xc8] sm:$0xff] %v2500_v18  ;;  %v1271_v20 = vpop.f32.mrb[18].mxu0  ;;  %v2540_v21 = vadd.f32 %v1841_v19, %v3952_v14  ;;  %v1843_v23 = vpop.f32.mrb[19].mxu1 }
 0x293   : > { %v2501_v22 = vadd.f32 %v1271_v20, %v3954_v15  ;;  %v1273_v24 = vpop.f32.mrb[19].mxu0 }
 0x294   : > { %v2502_v25 = vadd.f32 %v1273_v24, %v3956_v16  ;;  %1944 = vst [vmem:[%s3961_s9 + $0xe8] sm:$0xff] %v2540_v21 }
 0x295   : > { %1942 = vst [vmem:[%s3961_s9 + $0xd8] sm:$0xff] %v2501_v22  ;;  %v1846_v26 = vpop.f32.mrb[20].mxu1 }
 0x296   : > { %1943 = vst [vmem:[%s3961_s9 + $0xe0] sm:$0xff] %v2502_v25  ;;  %v1277_v27 = vpop.f32.mrb[20].mxu0  ;;  %v2541_v28 = vadd.f32 %v1846_v26, %v3952_v14  ;;  %v1848_v30 = vpop.f32.mrb[21].mxu1 }
 0x297   : > { %v2503_v29 = vadd.f32 %v1277_v27, %v3954_v15  ;;  %v1279_v31 = vpop.f32.mrb[21].mxu0 }
 0x298   : > { %v2504_v32 = vadd.f32 %v1279_v31, %v3956_v16  ;;  %1947 = vst [vmem:[%s3961_s9 + $0x100] sm:$0xff] %v2541_v28 }
 0x299   : > { %1945 = vst [vmem:[%s3961_s9 + $0xf0] sm:$0xff] %v2503_v29  ;;  %v1851_v33 = vpop.f32.mrb[22].mxu1 }
 0x29a   : > { %1946 = vst [vmem:[%s3961_s9 + $0xf8] sm:$0xff] %v2504_v32  ;;  %v1283_v34 = vpop.f32.mrb[22].mxu0  ;;  %v2542_v35 = vadd.f32 %v1851_v33, %v3952_v14  ;;  %v1853_v37 = vpop.f32.mrb[23].mxu1 }
 0x29b   : > { %v2505_v36 = vadd.f32 %v1283_v34, %v3954_v15  ;;  %v1285_v38 = vpop.f32.mrb[23].mxu0 }
 0x29c   : > { %v2506_v39 = vadd.f32 %v1285_v38, %v3956_v16  ;;  %1950 = vst [vmem:[%s3961_s9 + $0x118] sm:$0xff] %v2542_v35 }
 0x29d   : > { %1948 = vst [vmem:[%s3961_s9 + $0x108] sm:$0xff] %v2505_v36  ;;  %v1856_v40 = vpop.f32.mrb[24].mxu1 }
 0x29e   : > { %1949 = vst [vmem:[%s3961_s9 + $0x110] sm:$0xff] %v2506_v39  ;;  %v1289_v41 = vpop.f32.mrb[24].mxu0  ;;  %v2543_v42 = vadd.f32 %v1856_v40, %v3952_v14  ;;  %v1858_v44 = vpop.f32.mrb[25].mxu1 }
 0x29f   : > { %v2507_v43 = vadd.f32 %v1289_v41, %v3954_v15  ;;  %v1291_v45 = vpop.f32.mrb[25].mxu0 }
 0x2a0   : > { %v2508_v46 = vadd.f32 %v1291_v45, %v3956_v16  ;;  %1953 = vst [vmem:[%s3961_s9 + $0x130] sm:$0xff] %v2543_v42 }
 0x2a1   : > { %1951 = vst [vmem:[%s3961_s9 + $0x120] sm:$0xff] %v2507_v43  ;;  %v1861_v47 = vpop.f32.mrb[26].mxu1 }
 0x2a2   : > { %1952 = vst [vmem:[%s3961_s9 + $0x128] sm:$0xff] %v2508_v46  ;;  %v1295_v48 = vpop.f32.mrb[26].mxu0  ;;  %v2544_v49 = vadd.f32 %v1861_v47, %v3952_v14  ;;  %v1863_v51 = vpop.f32.mrb[27].mxu1 }
 0x2a3   : > { %v2509_v50 = vadd.f32 %v1295_v48, %v3954_v15  ;;  %v1297_v52 = vpop.f32.mrb[27].mxu0 }
 0x2a4   : > { %v2510_v53 = vadd.f32 %v1297_v52, %v3956_v16  ;;  %1956 = vst [vmem:[%s3961_s9 + $0x148] sm:$0xff] %v2544_v49 }
 0x2a5   : > { %1954 = vst [vmem:[%s3961_s9 + $0x138] sm:$0xff] %v2509_v50  ;;  %v1866_v54 = vpop.f32.mrb[28].mxu1 }
 0x2a6   : > { %1955 = vst [vmem:[%s3961_s9 + $0x140] sm:$0xff] %v2510_v53  ;;  %v1301_v55 = vpop.f32.mrb[28].mxu0  ;;  %v2545_v56 = vadd.f32 %v1866_v54, %v3952_v14  ;;  %v1868_v58 = vpop.f32.mrb[29].mxu1 }
 0x2a7   : > { %v2511_v57 = vadd.f32 %v1301_v55, %v3954_v15  ;;  %v1303_v59 = vpop.f32.mrb[29].mxu0 }
 0x2a8   : > { %v2512_v60 = vadd.f32 %v1303_v59, %v3956_v16  ;;  %1959 = vst [vmem:[%s3961_s9 + $0x160] sm:$0xff] %v2545_v56 }
 0x2a9   : > { %1957 = vst [vmem:[%s3961_s9 + $0x150] sm:$0xff] %v2511_v57  ;;  %v1871_v61 = vpop.f32.mrb[30].mxu1 }
 0x2aa   : > { %1958 = vst [vmem:[%s3961_s9 + $0x158] sm:$0xff] %v2512_v60  ;;  %v1307_v62 = vpop.f32.mrb[30].mxu0  ;;  %v2546_v63 = vadd.f32 %v1871_v61, %v3952_v14  ;;  %v1873_v2 = vpop.f32.mrb[31].mxu1 }
 0x2ab   : > { %v2513_v1 = vadd.f32 %v1307_v62, %v3954_v15  ;;  %v1309_v3 = vpop.f32.mrb[31].mxu0 }
 0x2ac   : > { %v2514_v4 = vadd.f32 %v1309_v3, %v3956_v16  ;;  %1962 = vst [vmem:[%s3961_s9 + $0x178] sm:$0xff] %v2546_v63 }
 0x2ad   : > { %1960 = vst [vmem:[%s3961_s9 + $0x168] sm:$0xff] %v2513_v1  ;;  %v1876_v5 = vpop.f32.mrb[32].mxu1 }
 0x2ae   : > { %1961 = vst [vmem:[%s3961_s9 + $0x170] sm:$0xff] %v2514_v4  ;;  %v1313_v6 = vpop.f32.mrb[32].mxu0  ;;  %v2547_v7 = vadd.f32 %v1876_v5, %v3952_v14  ;;  %v1878_v9 = vpop.f32.mrb[33].mxu1 }
 0x2af   : > { %v2515_v8 = vadd.f32 %v1313_v6, %v3954_v15  ;;  %v1315_v10 = vpop.f32.mrb[33].mxu0 }
 0x2b0   : > { %v2516_v11 = vadd.f32 %v1315_v10, %v3956_v16  ;;  %1965 = vst [vmem:[%s3961_s9 + $0x190] sm:$0xff] %v2547_v7 }
 0x2b1   : > { %1963 = vst [vmem:[%s3961_s9 + $0x180] sm:$0xff] %v2515_v8  ;;  %v1881_v12 = vpop.f32.mrb[34].mxu1 }
 0x2b2   : > { %1964 = vst [vmem:[%s3961_s9 + $0x188] sm:$0xff] %v2516_v11  ;;  %v1319_v13 = vpop.f32.mrb[34].mxu0  ;;  %v2548_v0 = vadd.f32 %v1881_v12, %v3952_v14  ;;  %v1883_v18 = vpop.f32.mrb[35].mxu1 }
 0x2b3   : > { %v2517_v17 = vadd.f32 %v1319_v13, %v3954_v15  ;;  %v1321_v19 = vpop.f32.mrb[35].mxu0 }
 0x2b4   : > { %v2518_v20 = vadd.f32 %v1321_v19, %v3956_v16  ;;  %1968 = vst [vmem:[%s3961_s9 + $0x1a8] sm:$0xff] %v2548_v0 }
 0x2b5   : > { %1966 = vst [vmem:[%s3961_s9 + $0x198] sm:$0xff] %v2517_v17  ;;  %v1886_v21 = vpop.f32.mrb[36].mxu1 }
 0x2b6   : > { %1967 = vst [vmem:[%s3961_s9 + $0x1a0] sm:$0xff] %v2518_v20  ;;  %v1325_v22 = vpop.f32.mrb[36].mxu0  ;;  %v2549_v23 = vadd.f32 %v1886_v21, %v3952_v14  ;;  %v1888_v25 = vpop.f32.mrb[37].mxu1 }
 0x2b7   : > { %v2519_v24 = vadd.f32 %v1325_v22, %v3954_v15  ;;  %v1327_v26 = vpop.f32.mrb[37].mxu0 }
 0x2b8   : > { %v2520_v27 = vadd.f32 %v1327_v26, %v3956_v16  ;;  %1971 = vst [vmem:[%s3961_s9 + $0x1c0] sm:$0xff] %v2549_v23 }
 0x2b9   : > { %1969 = vst [vmem:[%s3961_s9 + $0x1b0] sm:$0xff] %v2519_v24  ;;  %v1891_v28 = vpop.f32.mrb[38].mxu1 }
 0x2ba   : > { %1970 = vst [vmem:[%s3961_s9 + $0x1b8] sm:$0xff] %v2520_v27  ;;  %v1331_v29 = vpop.f32.mrb[38].mxu0  ;;  %v2550_v30 = vadd.f32 %v1891_v28, %v3952_v14  ;;  %v1893_v32 = vpop.f32.mrb[39].mxu1 }
 0x2bb   : > { %v2521_v31 = vadd.f32 %v1331_v29, %v3954_v15  ;;  %v1333_v33 = vpop.f32.mrb[39].mxu0 }
 0x2bc   : > { %v2522_v34 = vadd.f32 %v1333_v33, %v3956_v16  ;;  %1974 = vst [vmem:[%s3961_s9 + $0x1d8] sm:$0xff] %v2550_v30 }
 0x2bd   : > { %1972 = vst [vmem:[%s3961_s9 + $0x1c8] sm:$0xff] %v2521_v31  ;;  %v1896_v35 = vpop.f32.mrb[40].mxu1 }
 0x2be   : > { %1973 = vst [vmem:[%s3961_s9 + $0x1d0] sm:$0xff] %v2522_v34  ;;  %v1337_v36 = vpop.f32.mrb[40].mxu0  ;;  %v2551_v37 = vadd.f32 %v1896_v35, %v3952_v14  ;;  %v1898_v39 = vpop.f32.mrb[41].mxu1 }
 0x2bf   : > { %v2523_v38 = vadd.f32 %v1337_v36, %v3954_v15  ;;  %v1339_v40 = vpop.f32.mrb[41].mxu0 }
 0x2c0   : > { %v2524_v41 = vadd.f32 %v1339_v40, %v3956_v16  ;;  %1977 = vst [vmem:[%s3961_s9 + $0x1f0] sm:$0xff] %v2551_v37 }
 0x2c1   : > { %1975 = vst [vmem:[%s3961_s9 + $0x1e0] sm:$0xff] %v2523_v38  ;;  %v1901_v42 = vpop.f32.mrb[42].mxu1 }
 0x2c2   : > { %1976 = vst [vmem:[%s3961_s9 + $0x1e8] sm:$0xff] %v2524_v41  ;;  %v1343_v43 = vpop.f32.mrb[42].mxu0  ;;  %v2552_v44 = vadd.f32 %v1901_v42, %v3952_v14  ;;  %v1903_v46 = vpop.f32.mrb[43].mxu1 }
 0x2c3   : > { %v2525_v45 = vadd.f32 %v1343_v43, %v3954_v15  ;;  %v1345_v47 = vpop.f32.mrb[43].mxu0 }
 0x2c4   : > { %v2526_v48 = vadd.f32 %v1345_v47, %v3956_v16  ;;  %1980 = vst [vmem:[%s3961_s9 + $0x208] sm:$0xff] %v2552_v44 }
 0x2c5   : > { %1978 = vst [vmem:[%s3961_s9 + $0x1f8] sm:$0xff] %v2525_v45  ;;  %v1906_v49 = vpop.f32.mrb[44].mxu1 }
 0x2c6   : > { %1979 = vst [vmem:[%s3961_s9 + $0x200] sm:$0xff] %v2526_v48  ;;  %v1349_v50 = vpop.f32.mrb[44].mxu0  ;;  %v2553_v51 = vadd.f32 %v1906_v49, %v3952_v14  ;;  %v1908_v53 = vpop.f32.mrb[45].mxu1 }
 0x2c7   : > { %v2527_v52 = vadd.f32 %v1349_v50, %v3954_v15  ;;  %v1351_v54 = vpop.f32.mrb[45].mxu0 }
 0x2c8   : > { %v2528_v55 = vadd.f32 %v1351_v54, %v3956_v16  ;;  %1983 = vst [vmem:[%s3961_s9 + $0x220] sm:$0xff] %v2553_v51 }
 0x2c9   : > { %1981 = vst [vmem:[%s3961_s9 + $0x210] sm:$0xff] %v2527_v52  ;;  %v1911_v56 = vpop.f32.mrb[46].mxu1 }
 0x2ca   : > { %1982 = vst [vmem:[%s3961_s9 + $0x218] sm:$0xff] %v2528_v55  ;;  %v1355_v57 = vpop.f32.mrb[46].mxu0  ;;  %v2554_v58 = vadd.f32 %v1911_v56, %v3952_v14  ;;  %v1913_v60 = vpop.f32.mrb[47].mxu1 }
 0x2cb   : > { %v2529_v59 = vadd.f32 %v1355_v57, %v3954_v15  ;;  %v1357_v61 = vpop.f32.mrb[47].mxu0 }
 0x2cc   : > { %v2530_v62 = vadd.f32 %v1357_v61, %v3956_v16  ;;  %1986 = vst [vmem:[%s3961_s9 + $0x238] sm:$0xff] %v2554_v58 }
 0x2cd   : > { %1984 = vst [vmem:[%s3961_s9 + $0x228] sm:$0xff] %v2529_v59 }
 0x2ce   : > { %1985 = vst [vmem:[%s3961_s9 + $0x230] sm:$0xff] %v2530_v62 }
 0x2cf   : > { %3005 = shalt.err (!%p3002_p2)
}
 0x2d0   : > { %s3006_s1 = scalar_lea.hbm %s4104_s21, 9216  ;;  %s3010_s18 = scalar_lea.hbm %s4245_s3, 36864 }
 0x2d1   : > { %p3007_p12 = scmp.ne.s32.totalorder %s4104_s21, %s3006_s1  ;;  %p3011_p3 = scmp.lt.u32.totalorder %s4104_s21, %s4245_s3 }
 0x2d2   : > { %p3012_p6 = scmp.lt.u32.totalorder %s3010_s18, %s3006_s1  ;;  %p3014_p11 = scmp.lt.u32.totalorder %s3006_s1, %s4104_s21 }
 0x2d3   : > { %p3008_p0 = pnand %p3007_p12, %p4246_p4 }
 0x2d4   : > { %p3013_p5 = por %p3012_p6, %p3011_p3 }
 0x2d5   : > { %p3009_p13 = pneg %p3008_p0 }
 0x2d6   : > { %p3015_p10 = por %p3014_p11, %p3013_p5 }
 0x2d8   : > { %p3016_p1 = pnand %p3015_p10, %p3009_p13 }
 0x2da   : > { %3019 = shalt.err (!%p3016_p1)
}
 0x2db   : > { %s3153_s26 = smov 384   ;;  %s3154_s7 = smov 768  }
 0x2dc   : > { %s3155_s22 = smov 24  }
 0x2dd   : > { %2762 = dma.vmem_to_hbm [thread:$0]  (%p4246_p4), %s4108_s30, 9216, %s4104_s21, %s4116_s4, %s3153_s26, %s3154_s7, %s3155_s22  }
 0x2de PF: > { %p2781_p7 = scmp.ge.s32.totalorder %s3142_s25, 2  ;;  %s2019_s8 = sand.u32 1, %s3090_s12  }
 0x2df   : > { %p4247_p9 = scmp.ne.s32.totalorder %s4232_s15, 0  ;;  %s2020_s5 = scalar_lea.sflag [#allocation4], %s2019_s8 }
 0x2e1   : > { %p2775_p8 = pnand %p2781_p7, %p4247_p9 }
 0x2e3   : > { %3085 = dma.done.wait (!%p2775_p8), %s2020_s5, 9216  }
 0x2e4   : > { %3087 = vsyncadd (!%p2775_p8), %s2020_s5, 4294958080  ;;  %s22_s25 = sadd.s32 1, %s3142_s25   ;;  %s4249_s28 = sld [smem:[#allocation12_spill]] }
 0x2e5   : > { %p4145_p2 = scmp.ge.s32.totalorder %s22_s25, 6   ;;  %s4250_s14 = sld [smem:[#allocation20_spill]] }
 0x2e6   : > { %s4251_s30 = sld [smem:[#allocation19_spill]]  ;;  %s4252_s20 = sld [smem:[#allocation13_spill]] }
 0x2e7   : > { %s4253_s21 = sld [smem:[#allocation18_spill]]  ;;  %s4254_s4 = sld [smem:[#allocation15_spill]] }
 0x2e8   : > { %s4255_s23 = sld [smem:[#allocation16_spill]]  ;;  %s4256_s10 = sld [smem:[#allocation17_spill]] }
 0x2e9   : > { %s4257_s12 = smov %s3094_s13  ;;  %s4259_s15 = smov %s3106_s16 }
 0x2ea   : > { %s4258_s13 = smov %s4249_s28  ;;  %s4260_s16 = smov %s3110_s17 }
 0x2eb   : > { %s4262_s18 = smov %s3118_s19  ;;  %s4266_s22 = smov %s3138_s24 }
 0x2ec   : > { %s4261_s17 = smov %s4251_s30  ;;  %s4263_s19 = smov %s4252_s20 }
 0x2ed   : > { %s4264_s20 = smov %s4253_s21  ;;  %s4265_s21 = smov %s4254_s4 }
 0x2ee   : > { %s4267_s24 = smov %s4256_s10  ;;  %21 = sbr.rel (!%p4145_p2) target bundleno = 16 (0x10), region = 101 }
 0x2f5   :  { %2025 = vsyncpa [#allocation3], 1 }
 0x2f6   :  { %2027 = vsyncpa [#allocation3 + $0x1], 1 }
 0x2f7   :  { %2028 = vsyncpa [#allocation6], 1 }
 0x2f8   :  { %2030 = vsyncpa [#allocation6 + $0x1], 1 }
 0x2f9   :  { %2031 = vsyncpa [#allocation4], 1 }
 0x2fa   :  { %2033 = vsyncpa [#allocation4 + $0x1], 1 }

</bundles_post_ra>
